<compile_context>
chip_gen: v7x
topology: tpu7x:2x2x1
jax: 0.10.0
libtpu: 0.0.40
codegen_flags: <defaults>
</compile_context>

<pallas_src>
import functools
import math

import jax
import jax.numpy as jnp
from jax.experimental import pallas as pl
from jax.experimental.pallas import tpu as pltpu


# ----------------------------------------------------------------------------
# Pallas kernel: one BiLSTM layer, both directions fused, chunked over time.
# Grid iterates over time-chunks (sequential recurrence); h/c for both
# directions live in VMEM scratch and persist across grid steps.
# ----------------------------------------------------------------------------
def _bilstm_chunk_kernel(len_ref, gxf_ref, gxb_ref, whhf_ref, whhb_ref,
                         of_ref, ob_ref, hf, cf, hb, cb):
    ci = pl.program_id(0)
    nc = pl.num_programs(0)

    @pl.when(ci == 0)
    def _init():
        hf[...] = jnp.zeros_like(hf)
        cf[...] = jnp.zeros_like(cf)
        hb[...] = jnp.zeros_like(hb)
        cb[...] = jnp.zeros_like(cb)

    TT = of_ref.shape[0]            # timesteps per chunk (static)
    HP = hf.shape[-1]               # padded hidden size (multiple of 128)
    lengths = len_ref[...]          # (BP, HP) int32, row b = lengths[b]

    def cell(gx_t, h, c, whh_ref):
        # gx_t: (BP, 4HP) bf16, precomputed x @ W_ih^T + b
        gates = gx_t.astype(jnp.float32) + jnp.dot(
            h.astype(whh_ref.dtype), whh_ref[...],
            preferred_element_type=jnp.float32)           # (BP, 4HP) f32
        i_g = jax.nn.sigmoid(gates[:, 0 * HP:1 * HP])
        f_g = jax.nn.sigmoid(gates[:, 1 * HP:2 * HP])
        g_g = jnp.tanh(gates[:, 2 * HP:3 * HP])
        o_g = jax.nn.sigmoid(gates[:, 3 * HP:4 * HP])
        c_new = f_g * c + i_g * g_g
        h_new = o_g * jnp.tanh(c_new)
        return h_new, c_new

    def body(s, carry):
        # ---- forward direction: global timestep ci*TT + s
        t_f = ci * TT + s
        m_f = t_f < lengths                                # (BP, HP) bool
        h_prev, c_prev = hf[...], cf[...]
        h_new, c_new = cell(gxf_ref[s], h_prev, c_prev, whhf_ref)
        hf[...] = jnp.where(m_f, h_new, h_prev)            # freeze at padding
        cf[...] = jnp.where(m_f, c_new, c_prev)
        of_ref[s] = jnp.where(m_f, h_new, 0.0).astype(of_ref.dtype)

        # ---- backward direction: this grid step holds chunk nc-1-ci and
        # walks it back-to-front; global timestep (nc-1-ci)*TT + (TT-1-s)
        sb = TT - 1 - s
        t_b = (nc - 1 - ci) * TT + sb
        m_b = t_b < lengths
        h_prev, c_prev = hb[...], cb[...]
        h_new, c_new = cell(gxb_ref[sb], h_prev, c_prev, whhb_ref)
        hb[...] = jnp.where(m_b, h_new, h_prev)
        cb[...] = jnp.where(m_b, c_new, c_prev)
        ob_ref[sb] = jnp.where(m_b, h_new, 0.0).astype(ob_ref.dtype)
        return carry

    jax.lax.fori_loop(0, TT, body, 0, unroll=True)


def _bilstm_layer(len_bcast, gx_f, gx_b, whh_f_T, whh_b_T, *, chunk):
    """One fused BiLSTM layer. gx_*: (TP, BP, 4HP) precomputed gate inputs."""
    TP, BP, G4 = gx_f.shape
    HP = whh_f_T.shape[0]
    NC = TP // chunk
    wmap = lambda i: (0, 0)
    out_sds = jax.ShapeDtypeStruct((TP, BP, HP), gx_f.dtype)

    return pl.pallas_call(
        _bilstm_chunk_kernel,
        out_shape=(out_sds, out_sds),
        grid_spec=pltpu.PrefetchScalarGridSpec(
            num_scalar_prefetch=0,
            grid=(NC,),
            in_specs=[
                pl.BlockSpec((BP, HP), wmap),                           # lengths
                pl.BlockSpec((chunk, BP, G4), lambda i: (i, 0, 0)),      # gx fwd
                pl.BlockSpec((chunk, BP, G4), lambda i: (NC - 1 - i, 0, 0)),
                pl.BlockSpec((HP, G4), wmap),                            # Whh fwd
                pl.BlockSpec((HP, G4), wmap),                            # Whh bwd
            ],
            out_specs=[
                pl.BlockSpec((chunk, BP, HP), lambda i: (i, 0, 0)),
                pl.BlockSpec((chunk, BP, HP), lambda i: (NC - 1 - i, 0, 0)),
            ],
            scratch_shapes=[pltpu.VMEM((BP, HP), jnp.float32)] * 4,      # hf cf hb cb
        ),
        compiler_params=pltpu.CompilerParams(
            dimension_semantics=("arbitrary",)),          # time recurrence
    )(len_bcast, gx_f, gx_b, whh_f_T, whh_b_T)


# ----------------------------------------------------------------------------
# Parameters (raw nn.LSTM-shaped) + packing (pad/transpose/cast for kernels)
# ----------------------------------------------------------------------------
def init_params(key, hidden_dim, num_layers):
    """Deterministic params with exact nn.LSTM shapes and init range."""
    input_size = hidden_dim * 8
    k = 1.0 / math.sqrt(hidden_dim)
    params = []
    for layer in range(num_layers):
        in_l = input_size if layer == 0 else 2 * hidden_dim
        layer_params = {}
        for direction in ("fwd", "bwd"):
            key, k1, k2, k3, k4 = jax.random.split(key, 5)
            layer_params[direction] = {
                "w_ih": jax.random.uniform(k1, (4 * hidden_dim, in_l),
                                           minval=-k, maxval=k, dtype=jnp.float32),
                "w_hh": jax.random.uniform(k2, (4 * hidden_dim, hidden_dim),
                                           minval=-k, maxval=k, dtype=jnp.float32),
                "b_ih": jax.random.uniform(k3, (4 * hidden_dim,),
                                           minval=-k, maxval=k, dtype=jnp.float32),
                "b_hh": jax.random.uniform(k4, (4 * hidden_dim,),
                                           minval=-k, maxval=k, dtype=jnp.float32),
            }
        params.append(layer_params)
    return params


def _round_up(n, m):
    return ((n + m - 1) // m) * m


def _pad_gate_rows(w, H, HP):
    """(4H, X) PyTorch gate-major [i|f|g|o] -> (4HP, X), zero-pad per gate."""
    X = w.shape[1]
    return jnp.pad(w.reshape(4, H, X), ((0, 0), (0, HP - H), (0, 0))).reshape(4 * HP, X)


def _pack_params(raw_params, H, HP, dtype):
    packed = []
    for li, layer in enumerate(raw_params):
        entry_l = {}
        for d in ("fwd", "bwd"):
            p = layer[d]
            b = (p["b_ih"] + p["b_hh"]).astype(jnp.float32)
            b = jnp.pad(b.reshape(4, H), ((0, 0), (0, HP - H))).reshape(4 * HP)
            w_hh = _pad_gate_rows(p["w_hh"], H, HP)            # (4HP, H)
            w_hh = jnp.pad(w_hh, ((0, 0), (0, HP - H)))        # (4HP, HP)
            entry = {"b": b, "w_hh_T": w_hh.T.astype(dtype)}   # (HP, 4HP)
            if li == 0:
                w_ih = _pad_gate_rows(p["w_ih"], H, HP)        # (4HP, 8H)
                entry["w_ih_T"] = w_ih.T.astype(dtype)         # (8H, 4HP)
            else:
                # previous layer feeds its fwd/bwd halves separately (no concat)
                for name, cols in (("w_ih_T_f", slice(0, H)),
                                   ("w_ih_T_b", slice(H, 2 * H))):
                    w = _pad_gate_rows(p["w_ih"][:, cols], H, HP)   # (4HP, H)
                    w = jnp.pad(w, ((0, 0), (0, HP - H)))           # (4HP, HP)
                    entry[name] = w.T.astype(dtype)                 # (HP, 4HP)
            entry_l[d] = entry
        packed.append(entry_l)
    return packed


# ----------------------------------------------------------------------------
# Wrapper: full InferenceComposition forward
# ----------------------------------------------------------------------------
def inference_composition(x_btf, lengths, raw_params, *, hidden_dim,
                          chunk=8, dtype=jnp.bfloat16):
    """x_btf: (B, T, 8*H) f32, lengths: (B,) int. Returns (B, T, 2*H) f32;
    zeros at t >= lengths[b] (slice to max(lengths) to match
    pad_packed_sequence's time extent)."""
    B, T, _ = x_btf.shape
    H = hidden_dim
    HP = _round_up(H, 128)       # lane-aligned gate slices / lane-dense output
    BP = _round_up(B, 8)         # f32 sublane
    TP = _round_up(T, chunk)

    params = _pack_params(raw_params, H, HP, dtype)

    x_p = jnp.pad(x_btf, ((0, BP - B), (0, TP - T), (0, 0))).astype(dtype)
    len_p = jnp.pad(lengths.astype(jnp.int32), (0, BP - B))    # pad rows -> len 0
    len_bcast = jnp.broadcast_to(len_p[:, None], (BP, HP))

    out_f = out_b = None
    for li, lp in enumerate(params):
        gx = {}
        for d in ("fwd", "bwd"):
            if li == 0:
                # One big MXU matmul over all timesteps; the btf->tbg layout
                # change rides along with the matmul output layout.
                g = jnp.einsum("btf,fg->tbg", x_p, lp[d]["w_ih_T"],
                               preferred_element_type=jnp.float32)
            else:
                g = (jnp.einsum("tbh,hg->tbg", out_f, lp[d]["w_ih_T_f"],
                                preferred_element_type=jnp.float32)
                     + jnp.einsum("tbh,hg->tbg", out_b, lp[d]["w_ih_T_b"],
                                  preferred_element_type=jnp.float32))
            gx[d] = (g + lp[d]["b"]).astype(dtype)             # (TP, BP, 4HP)
        out_f, out_b = _bilstm_layer(len_bcast, gx["fwd"], gx["bwd"],
                                     lp["fwd"]["w_hh_T"], lp["bwd"]["w_hh_T"],
                                     chunk=chunk)

    out = jnp.concatenate([out_f[:, :, :H], out_b[:, :, :H]], axis=-1)
    out = out[:T, :B].astype(jnp.float32)                      # (T, B, 2H)
    return jnp.transpose(out, (1, 0, 2))                       # (B, T, 2H)


# ----------------------------------------------------------------------------
# Pure-JAX reference (lax.scan) with matching bf16 casts, for correctness
# ----------------------------------------------------------------------------
def _ref_direction(gx, mask_tb, w_hh, H, reverse):
    T, B, _ = gx.shape
    order = jnp.arange(T - 1, -1, -1) if reverse else jnp.arange(T)

    def step(carry, t):
        h, c = carry
        gates = gx[t].astype(jnp.float32) + jnp.einsum(
            "bh,gh->bg", h.astype(w_hh.dtype), w_hh,
            preferred_element_type=jnp.float32)
        i = jax.nn.sigmoid(gates[:, :H])
        f = jax.nn.sigmoid(gates[:, H:2 * H])
        g = jnp.tanh(gates[:, 2 * H:3 * H])
        o = jax.nn.sigmoid(gates[:, 3 * H:])
        c_new = f * c + i * g
        h_new = o * jnp.tanh(c_new)
        m = mask_tb[t][:, None]
        h = jnp.where(m, h_new, h)
        c = jnp.where(m, c_new, c)
        return (h, c), jnp.where(m, h_new, 0.0).astype(gx.dtype)

    init = (jnp.zeros((B, H), jnp.float32), jnp.zeros((B, H), jnp.float32))
    _, ys = jax.lax.scan(step, init, order)
    if reverse:
        ys = ys[::-1]
    return ys                                                   # (T, B, H)


def reference(x_btf, lengths, raw_params, *, hidden_dim, dtype=jnp.bfloat16):
    B, T, _ = x_btf.shape
    H = hidden_dim
    xt = jnp.transpose(x_btf, (1, 0, 2)).astype(dtype)          # (T, B, 8H)
    mask = jnp.arange(T)[:, None] < lengths[None, :]            # (T, B)
    out_f = out_b = None
    for li, layer in enumerate(raw_params):
        new_out = {}
        for d in ("fwd", "bwd"):
            p = layer[d]
            w_ih = p["w_ih"].astype(dtype)
            w_hh = p["w_hh"].astype(dtype)
            b = (p["b_ih"] + p["b_hh"]).astype(jnp.float32)
            if li == 0:
                g = jnp.einsum("tbf,gf->tbg", xt, w_ih,
                               preferred_element_type=jnp.float32)
            else:
                g = (jnp.einsum("tbh,gh->tbg", out_f, w_ih[:, :H],
                                preferred_element_type=jnp.float32)
                     + jnp.einsum("tbh,gh->tbg", out_b, w_ih[:, H:],
                                  preferred_element_type=jnp.float32))
            gx = (g + b).astype(dtype)
            new_out[d] = _ref_direction(gx, mask, w_hh, H, reverse=(d == "bwd"))
        out_f, out_b = new_out["fwd"], new_out["bwd"]
    out = jnp.concatenate([out_f, out_b], axis=-1).astype(jnp.float32)
    return jnp.transpose(out, (1, 0, 2))                        # (B, T, 2H)


if __name__ == "__main__":
    hidden_dim = 32
    num_layers = 2
    B, T = 2, 8
    input_size = hidden_dim * 8

    key = jax.random.PRNGKey(0)
    key, kx = jax.random.split(key)
    x = jax.random.normal(kx, (B, T, input_size), dtype=jnp.float32)
    lengths = jnp.array([8, 5], dtype=jnp.int32)
    params = init_params(key, hidden_dim, num_layers)

    run = jax.jit(functools.partial(inference_composition,
                                    hidden_dim=hidden_dim, chunk=4))
    out_full = jax.block_until_ready(run(x, lengths, params))

    # pad_packed_sequence pads only up to max(lengths)
    t_out = int(lengths.max())
    out = out_full[:, :t_out, :]                                # (B, max_len, 2H)

    ref = reference(x, lengths, params, hidden_dim=hidden_dim)[:, :t_out, :]
    assert out.shape == (B, t_out, 2 * hidden_dim)
    max_err = float(jnp.max(jnp.abs(out - ref)))
    assert jnp.allclose(out, ref, atol=1e-2, rtol=1e-2), (
        f"mismatch vs reference (max abs err {max_err})")

    print("KERNEL_OK")
</pallas_src>

<mosaic_0001>
module attributes {stable_mosaic.version = 11 : i64} {
  func.func @_bilstm_chunk_kernel(%arg0: i32, %arg1: memref<8x128xi32, #tpu.memory_space<vmem>>, %arg2: memref<4x8x512xbf16, #tpu.memory_space<vmem>>, %arg3: memref<4x8x512xbf16, #tpu.memory_space<vmem>>, %arg4: memref<128x512xbf16, #tpu.memory_space<vmem>>, %arg5: memref<128x512xbf16, #tpu.memory_space<vmem>>, %arg6: memref<4x8x128xbf16, #tpu.memory_space<vmem>>, %arg7: memref<4x8x128xbf16, #tpu.memory_space<vmem>>, %arg8: memref<8x128xf32, #tpu.memory_space<vmem>>, %arg9: memref<8x128xf32, #tpu.memory_space<vmem>>, %arg10: memref<8x128xf32, #tpu.memory_space<vmem>>, %arg11: memref<8x128xf32, #tpu.memory_space<vmem>>) attributes {dimension_semantics = [#tpu.dimension_semantics<arbitrary>], iteration_bounds = array<i64: 2>, scalar_prefetch = 0 : i64, scratch_operands = 4 : i64, tpu.core_type = #tpu.core_type<tc>, window_params = [{pipeline_mode = #tpu.pipeline_mode<synchronous>, transform_indices = @transform_0, window_bounds = array<i64: 8, 128>}, {transform_indices = @transform_1, window_bounds = array<i64: 4, 8, 512>}, {transform_indices = @transform_2, window_bounds = array<i64: 4, 8, 512>}, {pipeline_mode = #tpu.pipeline_mode<synchronous>, transform_indices = @transform_3, window_bounds = array<i64: 128, 512>}, {pipeline_mode = #tpu.pipeline_mode<synchronous>, transform_indices = @transform_4, window_bounds = array<i64: 128, 512>}, {transform_indices = @transform_5, window_bounds = array<i64: 4, 8, 128>}, {transform_indices = @transform_6, window_bounds = array<i64: 4, 8, 128>}]} {
    %c0_i32 = arith.constant 0 : i32
    %0 = arith.cmpi eq, %arg0, %c0_i32 : i32
    %1 = arith.extui %0 : i1 to i32
    %c0_i32_0 = arith.constant 0 : i32
    %2 = arith.cmpi ne, %1, %c0_i32_0 : i32
    scf.if %2 {
      %cst_170 = arith.constant 0.000000e+00 : f32
      %412 = vector.broadcast %cst_170 : f32 to vector<8x128xf32>
      %c0_171 = arith.constant 0 : index
      %c0_172 = arith.constant 0 : index
      %413 = vector.load %arg8[%c0_171, %c0_172] : memref<8x128xf32, #tpu.memory_space<vmem>>, vector<8x128xf32>
      tpu.vector_store %arg8[%c0_171, %c0_172], %412 {strides = array<i32>} : memref<8x128xf32, #tpu.memory_space<vmem>>, vector<8x128xf32>,
      %cst_173 = arith.constant 0.000000e+00 : f32
      %414 = vector.broadcast %cst_173 : f32 to vector<8x128xf32>
      %c0_174 = arith.constant 0 : index
      %c0_175 = arith.constant 0 : index
      %415 = vector.load %arg9[%c0_174, %c0_175] : memref<8x128xf32, #tpu.memory_space<vmem>>, vector<8x128xf32>
      tpu.vector_store %arg9[%c0_174, %c0_175], %414 {strides = array<i32>} : memref<8x128xf32, #tpu.memory_space<vmem>>, vector<8x128xf32>,
      %cst_176 = arith.constant 0.000000e+00 : f32
      %416 = vector.broadcast %cst_176 : f32 to vector<8x128xf32>
      %c0_177 = arith.constant 0 : index
      %c0_178 = arith.constant 0 : index
      %417 = vector.load %arg10[%c0_177, %c0_178] : memref<8x128xf32, #tpu.memory_space<vmem>>, vector<8x128xf32>
      tpu.vector_store %arg10[%c0_177, %c0_178], %416 {strides = array<i32>} : memref<8x128xf32, #tpu.memory_space<vmem>>, vector<8x128xf32>,
      %cst_179 = arith.constant 0.000000e+00 : f32
      %418 = vector.broadcast %cst_179 : f32 to vector<8x128xf32>
      %c0_180 = arith.constant 0 : index
      %c0_181 = arith.constant 0 : index
      %419 = vector.load %arg11[%c0_180, %c0_181] : memref<8x128xf32, #tpu.memory_space<vmem>>, vector<8x128xf32>
      tpu.vector_store %arg11[%c0_180, %c0_181], %418 {strides = array<i32>} : memref<8x128xf32, #tpu.memory_space<vmem>>, vector<8x128xf32>,
    } else {
    }
    %c0 = arith.constant 0 : index
    %c0_1 = arith.constant 0 : index
    %3 = vector.load %arg1[%c0, %c0_1] : memref<8x128xi32, #tpu.memory_space<vmem>>, vector<8x128xi32>
    %c0_i32_2 = arith.constant 0 : i32
    %c4_i32 = arith.constant 4 : i32
    %4 = arith.muli %arg0, %c4_i32 : i32
    %5 = arith.addi %4, %c0_i32_2 : i32
    %6 = vector.broadcast %5 : i32 to vector<8x128xi32>
    %7 = arith.cmpi slt, %6, %3 : vector<8x128xi32>
    %c0_3 = arith.constant 0 : index
    %c0_4 = arith.constant 0 : index
    %8 = vector.load %arg8[%c0_3, %c0_4] : memref<8x128xf32, #tpu.memory_space<vmem>>, vector<8x128xf32>
    %c0_5 = arith.constant 0 : index
    %c0_6 = arith.constant 0 : index
    %9 = vector.load %arg9[%c0_5, %c0_6] : memref<8x128xf32, #tpu.memory_space<vmem>>, vector<8x128xf32>
    %10 = arith.index_cast %c0_i32_2 : i32 to index
    %c0_7 = arith.constant 0 : index
    %c0_8 = arith.constant 0 : index
    %11 = vector.load %arg2[%10, %c0_7, %c0_8] : memref<4x8x512xbf16, #tpu.memory_space<vmem>>, vector<1x8x512xbf16>
    %12 = vector.shape_cast %11 : vector<1x8x512xbf16> to vector<8x512xbf16>
    %13 = arith.extf %12 : vector<8x512xbf16> to vector<8x512xf32>
    %14 = arith.truncf %8 : vector<8x128xf32> to vector<8x128xbf16>
    %c0_9 = arith.constant 0 : index
    %c0_10 = arith.constant 0 : index
    %15 = vector.load %arg4[%c0_9, %c0_10] : memref<128x512xbf16, #tpu.memory_space<vmem>>, vector<128x512xbf16>
    %cst = arith.constant dense<0.000000e+00> : vector<8x512xf32>
    %16 = tpu.matmul %14, %15, %cst {dimension_numbers = #tpu.dot_dimension_numbers<[1], [0], [0], [1], [0, 0, 1, 1], [], []>} : vector<8x128xbf16>, vector<128x512xbf16>, vector<8x512xf32> -> vector<8x512xf32>
    %17 = arith.addf %13, %16 : vector<8x512xf32>
    %18 = vector.extract_strided_slice %17 {offsets = [0, 0], sizes = [8, 128], strides = [1, 1]} : vector<8x512xf32> to vector<8x128xf32>
    %19 = arith.negf %18 : vector<8x128xf32>
    %20 = math.exp %19 : vector<8x128xf32>
    %cst_11 = arith.constant 1.000000e+00 : f32
    %21 = vector.broadcast %cst_11 : f32 to vector<8x128xf32>
    %22 = arith.addf %21, %20 : vector<8x128xf32>
    %23 = arith.divf %21, %22 : vector<8x128xf32>
    %24 = vector.extract_strided_slice %17 {offsets = [0, 128], sizes = [8, 128], strides = [1, 1]} : vector<8x512xf32> to vector<8x128xf32>
    %25 = arith.negf %24 : vector<8x128xf32>
    %26 = math.exp %25 : vector<8x128xf32>
    %cst_12 = arith.constant 1.000000e+00 : f32
    %27 = vector.broadcast %cst_12 : f32 to vector<8x128xf32>
    %28 = arith.addf %27, %26 : vector<8x128xf32>
    %29 = arith.divf %27, %28 : vector<8x128xf32>
    %30 = vector.extract_strided_slice %17 {offsets = [0, 256], sizes = [8, 128], strides = [1, 1]} : vector<8x512xf32> to vector<8x128xf32>
    %31 = math.tanh %30 : vector<8x128xf32>
    %32 = vector.extract_strided_slice %17 {offsets = [0, 384], sizes = [8, 128], strides = [1, 1]} : vector<8x512xf32> to vector<8x128xf32>
    %33 = arith.negf %32 : vector<8x128xf32>
    %34 = math.exp %33 : vector<8x128xf32>
    %cst_13 = arith.constant 1.000000e+00 : f32
    %35 = vector.broadcast %cst_13 : f32 to vector<8x128xf32>
    %36 = arith.addf %35, %34 : vector<8x128xf32>
    %37 = arith.divf %35, %36 : vector<8x128xf32>
    %38 = arith.mulf %29, %9 : vector<8x128xf32>
    %39 = arith.mulf %23, %31 : vector<8x128xf32>
    %40 = arith.addf %38, %39 : vector<8x128xf32>
    %41 = math.tanh %40 : vector<8x128xf32>
    %42 = arith.mulf %37, %41 : vector<8x128xf32>
    %43 = arith.select %7, %42, %8 : vector<8x128xi1>, vector<8x128xf32>
    %c0_14 = arith.constant 0 : index
    %c0_15 = arith.constant 0 : index
    %44 = vector.load %arg8[%c0_14, %c0_15] : memref<8x128xf32, #tpu.memory_space<vmem>>, vector<8x128xf32>
    tpu.vector_store %arg8[%c0_14, %c0_15], %43 {strides = array<i32>} : memref<8x128xf32, #tpu.memory_space<vmem>>, vector<8x128xf32>,
    %45 = arith.select %7, %40, %9 : vector<8x128xi1>, vector<8x128xf32>
    %c0_16 = arith.constant 0 : index
    %c0_17 = arith.constant 0 : index
    %46 = vector.load %arg9[%c0_16, %c0_17] : memref<8x128xf32, #tpu.memory_space<vmem>>, vector<8x128xf32>
    tpu.vector_store %arg9[%c0_16, %c0_17], %45 {strides = array<i32>} : memref<8x128xf32, #tpu.memory_space<vmem>>, vector<8x128xf32>,
    %cst_18 = arith.constant 0.000000e+00 : f32
    %47 = vector.broadcast %cst_18 : f32 to vector<8x128xf32>
    %48 = arith.select %7, %42, %47 : vector<8x128xi1>, vector<8x128xf32>
    %49 = arith.truncf %48 : vector<8x128xf32> to vector<8x128xbf16>
    %50 = arith.index_cast %c0_i32_2 : i32 to index
    %c0_19 = arith.constant 0 : index
    %c0_20 = arith.constant 0 : index
    %51 = vector.load %arg6[%50, %c0_19, %c0_20] : memref<4x8x128xbf16, #tpu.memory_space<vmem>>, vector<1x8x128xbf16>
    %52 = vector.shape_cast %51 : vector<1x8x128xbf16> to vector<8x128xbf16>
    %53 = vector.shape_cast %49 : vector<8x128xbf16> to vector<1x8x128xbf16>
    tpu.vector_store %arg6[%50, %c0_19, %c0_20], %53 {strides = array<i32>} : memref<4x8x128xbf16, #tpu.memory_space<vmem>>, vector<1x8x128xbf16>,
    %c3_i32 = arith.constant 3 : i32
    %54 = arith.subi %c3_i32, %c0_i32_2 : i32
    %c1_i32 = arith.constant 1 : i32
    %55 = arith.subi %c1_i32, %arg0 : i32
    %c4_i32_21 = arith.constant 4 : i32
    %56 = arith.muli %55, %c4_i32_21 : i32
    %57 = arith.addi %56, %54 : i32
    %58 = vector.broadcast %57 : i32 to vector<8x128xi32>
    %59 = arith.cmpi slt, %58, %3 : vector<8x128xi32>
    %c0_22 = arith.constant 0 : index
    %c0_23 = arith.constant 0 : index
    %60 = vector.load %arg10[%c0_22, %c0_23] : memref<8x128xf32, #tpu.memory_space<vmem>>, vector<8x128xf32>
    %c0_24 = arith.constant 0 : index
    %c0_25 = arith.constant 0 : index
    %61 = vector.load %arg11[%c0_24, %c0_25] : memref<8x128xf32, #tpu.memory_space<vmem>>, vector<8x128xf32>
    %62 = arith.index_cast %54 : i32 to index
    %c0_26 = arith.constant 0 : index
    %c0_27 = arith.constant 0 : index
    %63 = vector.load %arg3[%62, %c0_26, %c0_27] : memref<4x8x512xbf16, #tpu.memory_space<vmem>>, vector<1x8x512xbf16>
    %64 = vector.shape_cast %63 : vector<1x8x512xbf16> to vector<8x512xbf16>
    %65 = arith.extf %64 : vector<8x512xbf16> to vector<8x512xf32>
    %66 = arith.truncf %60 : vector<8x128xf32> to vector<8x128xbf16>
    %c0_28 = arith.constant 0 : index
    %c0_29 = arith.constant 0 : index
    %67 = vector.load %arg5[%c0_28, %c0_29] : memref<128x512xbf16, #tpu.memory_space<vmem>>, vector<128x512xbf16>
    %cst_30 = arith.constant dense<0.000000e+00> : vector<8x512xf32>
    %68 = tpu.matmul %66, %67, %cst_30 {dimension_numbers = #tpu.dot_dimension_numbers<[1], [0], [0], [1], [0, 0, 1, 1], [], []>} : vector<8x128xbf16>, vector<128x512xbf16>, vector<8x512xf32> -> vector<8x512xf32>
    %69 = arith.addf %65, %68 : vector<8x512xf32>
    %70 = vector.extract_strided_slice %69 {offsets = [0, 0], sizes = [8, 128], strides = [1, 1]} : vector<8x512xf32> to vector<8x128xf32>
    %71 = arith.negf %70 : vector<8x128xf32>
    %72 = math.exp %71 : vector<8x128xf32>
    %cst_31 = arith.constant 1.000000e+00 : f32
    %73 = vector.broadcast %cst_31 : f32 to vector<8x128xf32>
    %74 = arith.addf %73, %72 : vector<8x128xf32>
    %75 = arith.divf %73, %74 : vector<8x128xf32>
    %76 = vector.extract_strided_slice %69 {offsets = [0, 128], sizes = [8, 128], strides = [1, 1]} : vector<8x512xf32> to vector<8x128xf32>
    %77 = arith.negf %76 : vector<8x128xf32>
    %78 = math.exp %77 : vector<8x128xf32>
    %cst_32 = arith.constant 1.000000e+00 : f32
    %79 = vector.broadcast %cst_32 : f32 to vector<8x128xf32>
    %80 = arith.addf %79, %78 : vector<8x128xf32>
    %81 = arith.divf %79, %80 : vector<8x128xf32>
    %82 = vector.extract_strided_slice %69 {offsets = [0, 256], sizes = [8, 128], strides = [1, 1]} : vector<8x512xf32> to vector<8x128xf32>
    %83 = math.tanh %82 : vector<8x128xf32>
    %84 = vector.extract_strided_slice %69 {offsets = [0, 384], sizes = [8, 128], strides = [1, 1]} : vector<8x512xf32> to vector<8x128xf32>
    %85 = arith.negf %84 : vector<8x128xf32>
    %86 = math.exp %85 : vector<8x128xf32>
    %cst_33 = arith.constant 1.000000e+00 : f32
    %87 = vector.broadcast %cst_33 : f32 to vector<8x128xf32>
    %88 = arith.addf %87, %86 : vector<8x128xf32>
    %89 = arith.divf %87, %88 : vector<8x128xf32>
    %90 = arith.mulf %81, %61 : vector<8x128xf32>
    %91 = arith.mulf %75, %83 : vector<8x128xf32>
    %92 = arith.addf %90, %91 : vector<8x128xf32>
    %93 = math.tanh %92 : vector<8x128xf32>
    %94 = arith.mulf %89, %93 : vector<8x128xf32>
    %95 = arith.select %59, %94, %60 : vector<8x128xi1>, vector<8x128xf32>
    %c0_34 = arith.constant 0 : index
    %c0_35 = arith.constant 0 : index
    %96 = vector.load %arg10[%c0_34, %c0_35] : memref<8x128xf32, #tpu.memory_space<vmem>>, vector<8x128xf32>
    tpu.vector_store %arg10[%c0_34, %c0_35], %95 {strides = array<i32>} : memref<8x128xf32, #tpu.memory_space<vmem>>, vector<8x128xf32>,
    %97 = arith.select %59, %92, %61 : vector<8x128xi1>, vector<8x128xf32>
    %c0_36 = arith.constant 0 : index
    %c0_37 = arith.constant 0 : index
    %98 = vector.load %arg11[%c0_36, %c0_37] : memref<8x128xf32, #tpu.memory_space<vmem>>, vector<8x128xf32>
    tpu.vector_store %arg11[%c0_36, %c0_37], %97 {strides = array<i32>} : memref<8x128xf32, #tpu.memory_space<vmem>>, vector<8x128xf32>,
    %cst_38 = arith.constant 0.000000e+00 : f32
    %99 = vector.broadcast %cst_38 : f32 to vector<8x128xf32>
    %100 = arith.select %59, %94, %99 : vector<8x128xi1>, vector<8x128xf32>
    %101 = arith.truncf %100 : vector<8x128xf32> to vector<8x128xbf16>
    %102 = arith.index_cast %54 : i32 to index
    %c0_39 = arith.constant 0 : index
    %c0_40 = arith.constant 0 : index
    %103 = vector.load %arg7[%102, %c0_39, %c0_40] : memref<4x8x128xbf16, #tpu.memory_space<vmem>>, vector<1x8x128xbf16>
    %104 = vector.shape_cast %103 : vector<1x8x128xbf16> to vector<8x128xbf16>
    %105 = vector.shape_cast %101 : vector<8x128xbf16> to vector<1x8x128xbf16>
    tpu.vector_store %arg7[%102, %c0_39, %c0_40], %105 {strides = array<i32>} : memref<4x8x128xbf16, #tpu.memory_space<vmem>>, vector<1x8x128xbf16>,
    %c1_i32_41 = arith.constant 1 : i32
    %c4_i32_42 = arith.constant 4 : i32
    %106 = arith.muli %arg0, %c4_i32_42 : i32
    %107 = arith.addi %106, %c1_i32_41 : i32
    %108 = vector.broadcast %107 : i32 to vector<8x128xi32>
    %109 = arith.cmpi slt, %108, %3 : vector<8x128xi32>
    %c0_43 = arith.constant 0 : index
    %c0_44 = arith.constant 0 : index
    %110 = vector.load %arg8[%c0_43, %c0_44] : memref<8x128xf32, #tpu.memory_space<vmem>>, vector<8x128xf32>
    %c0_45 = arith.constant 0 : index
    %c0_46 = arith.constant 0 : index
    %111 = vector.load %arg9[%c0_45, %c0_46] : memref<8x128xf32, #tpu.memory_space<vmem>>, vector<8x128xf32>
    %112 = arith.index_cast %c1_i32_41 : i32 to index
    %c0_47 = arith.constant 0 : index
    %c0_48 = arith.constant 0 : index
    %113 = vector.load %arg2[%112, %c0_47, %c0_48] : memref<4x8x512xbf16, #tpu.memory_space<vmem>>, vector<1x8x512xbf16>
    %114 = vector.shape_cast %113 : vector<1x8x512xbf16> to vector<8x512xbf16>
    %115 = arith.extf %114 : vector<8x512xbf16> to vector<8x512xf32>
    %116 = arith.truncf %110 : vector<8x128xf32> to vector<8x128xbf16>
    %c0_49 = arith.constant 0 : index
    %c0_50 = arith.constant 0 : index
    %117 = vector.load %arg4[%c0_49, %c0_50] : memref<128x512xbf16, #tpu.memory_space<vmem>>, vector<128x512xbf16>
    %cst_51 = arith.constant dense<0.000000e+00> : vector<8x512xf32>
    %118 = tpu.matmul %116, %117, %cst_51 {dimension_numbers = #tpu.dot_dimension_numbers<[1], [0], [0], [1], [0, 0, 1, 1], [], []>} : vector<8x128xbf16>, vector<128x512xbf16>, vector<8x512xf32> -> vector<8x512xf32>
    %119 = arith.addf %115, %118 : vector<8x512xf32>
    %120 = vector.extract_strided_slice %119 {offsets = [0, 0], sizes = [8, 128], strides = [1, 1]} : vector<8x512xf32> to vector<8x128xf32>
    %121 = arith.negf %120 : vector<8x128xf32>
    %122 = math.exp %121 : vector<8x128xf32>
    %cst_52 = arith.constant 1.000000e+00 : f32
    %123 = vector.broadcast %cst_52 : f32 to vector<8x128xf32>
    %124 = arith.addf %123, %122 : vector<8x128xf32>
    %125 = arith.divf %123, %124 : vector<8x128xf32>
    %126 = vector.extract_strided_slice %119 {offsets = [0, 128], sizes = [8, 128], strides = [1, 1]} : vector<8x512xf32> to vector<8x128xf32>
    %127 = arith.negf %126 : vector<8x128xf32>
    %128 = math.exp %127 : vector<8x128xf32>
    %cst_53 = arith.constant 1.000000e+00 : f32
    %129 = vector.broadcast %cst_53 : f32 to vector<8x128xf32>
    %130 = arith.addf %129, %128 : vector<8x128xf32>
    %131 = arith.divf %129, %130 : vector<8x128xf32>
    %132 = vector.extract_strided_slice %119 {offsets = [0, 256], sizes = [8, 128], strides = [1, 1]} : vector<8x512xf32> to vector<8x128xf32>
    %133 = math.tanh %132 : vector<8x128xf32>
    %134 = vector.extract_strided_slice %119 {offsets = [0, 384], sizes = [8, 128], strides = [1, 1]} : vector<8x512xf32> to vector<8x128xf32>
    %135 = arith.negf %134 : vector<8x128xf32>
    %136 = math.exp %135 : vector<8x128xf32>
    %cst_54 = arith.constant 1.000000e+00 : f32
    %137 = vector.broadcast %cst_54 : f32 to vector<8x128xf32>
    %138 = arith.addf %137, %136 : vector<8x128xf32>
    %139 = arith.divf %137, %138 : vector<8x128xf32>
    %140 = arith.mulf %131, %111 : vector<8x128xf32>
    %141 = arith.mulf %125, %133 : vector<8x128xf32>
    %142 = arith.addf %140, %141 : vector<8x128xf32>
    %143 = math.tanh %142 : vector<8x128xf32>
    %144 = arith.mulf %139, %143 : vector<8x128xf32>
    %145 = arith.select %109, %144, %110 : vector<8x128xi1>, vector<8x128xf32>
    %c0_55 = arith.constant 0 : index
    %c0_56 = arith.constant 0 : index
    %146 = vector.load %arg8[%c0_55, %c0_56] : memref<8x128xf32, #tpu.memory_space<vmem>>, vector<8x128xf32>
    tpu.vector_store %arg8[%c0_55, %c0_56], %145 {strides = array<i32>} : memref<8x128xf32, #tpu.memory_space<vmem>>, vector<8x128xf32>,
    %147 = arith.select %109, %142, %111 : vector<8x128xi1>, vector<8x128xf32>
    %c0_57 = arith.constant 0 : index
    %c0_58 = arith.constant 0 : index
    %148 = vector.load %arg9[%c0_57, %c0_58] : memref<8x128xf32, #tpu.memory_space<vmem>>, vector<8x128xf32>
    tpu.vector_store %arg9[%c0_57, %c0_58], %147 {strides = array<i32>} : memref<8x128xf32, #tpu.memory_space<vmem>>, vector<8x128xf32>,
    %cst_59 = arith.constant 0.000000e+00 : f32
    %149 = vector.broadcast %cst_59 : f32 to vector<8x128xf32>
    %150 = arith.select %109, %144, %149 : vector<8x128xi1>, vector<8x128xf32>
    %151 = arith.truncf %150 : vector<8x128xf32> to vector<8x128xbf16>
    %152 = arith.index_cast %c1_i32_41 : i32 to index
    %c0_60 = arith.constant 0 : index
    %c0_61 = arith.constant 0 : index
    %153 = vector.load %arg6[%152, %c0_60, %c0_61] : memref<4x8x128xbf16, #tpu.memory_space<vmem>>, vector<1x8x128xbf16>
    %154 = vector.shape_cast %153 : vector<1x8x128xbf16> to vector<8x128xbf16>
    %155 = vector.shape_cast %151 : vector<8x128xbf16> to vector<1x8x128xbf16>
    tpu.vector_store %arg6[%152, %c0_60, %c0_61], %155 {strides = array<i32>} : memref<4x8x128xbf16, #tpu.memory_space<vmem>>, vector<1x8x128xbf16>,
    %c3_i32_62 = arith.constant 3 : i32
    %156 = arith.subi %c3_i32_62, %c1_i32_41 : i32
    %c1_i32_63 = arith.constant 1 : i32
    %157 = arith.subi %c1_i32_63, %arg0 : i32
    %c4_i32_64 = arith.constant 4 : i32
    %158 = arith.muli %157, %c4_i32_64 : i32
    %159 = arith.addi %158, %156 : i32
    %160 = vector.broadcast %159 : i32 to vector<8x128xi32>
    %161 = arith.cmpi slt, %160, %3 : vector<8x128xi32>
    %c0_65 = arith.constant 0 : index
    %c0_66 = arith.constant 0 : index
    %162 = vector.load %arg10[%c0_65, %c0_66] : memref<8x128xf32, #tpu.memory_space<vmem>>, vector<8x128xf32>
    %c0_67 = arith.constant 0 : index
    %c0_68 = arith.constant 0 : index
    %163 = vector.load %arg11[%c0_67, %c0_68] : memref<8x128xf32, #tpu.memory_space<vmem>>, vector<8x128xf32>
    %164 = arith.index_cast %156 : i32 to index
    %c0_69 = arith.constant 0 : index
    %c0_70 = arith.constant 0 : index
    %165 = vector.load %arg3[%164, %c0_69, %c0_70] : memref<4x8x512xbf16, #tpu.memory_space<vmem>>, vector<1x8x512xbf16>
    %166 = vector.shape_cast %165 : vector<1x8x512xbf16> to vector<8x512xbf16>
    %167 = arith.extf %166 : vector<8x512xbf16> to vector<8x512xf32>
    %168 = arith.truncf %162 : vector<8x128xf32> to vector<8x128xbf16>
    %c0_71 = arith.constant 0 : index
    %c0_72 = arith.constant 0 : index
    %169 = vector.load %arg5[%c0_71, %c0_72] : memref<128x512xbf16, #tpu.memory_space<vmem>>, vector<128x512xbf16>
    %cst_73 = arith.constant dense<0.000000e+00> : vector<8x512xf32>
    %170 = tpu.matmul %168, %169, %cst_73 {dimension_numbers = #tpu.dot_dimension_numbers<[1], [0], [0], [1], [0, 0, 1, 1], [], []>} : vector<8x128xbf16>, vector<128x512xbf16>, vector<8x512xf32> -> vector<8x512xf32>
    %171 = arith.addf %167, %170 : vector<8x512xf32>
    %172 = vector.extract_strided_slice %171 {offsets = [0, 0], sizes = [8, 128], strides = [1, 1]} : vector<8x512xf32> to vector<8x128xf32>
    %173 = arith.negf %172 : vector<8x128xf32>
    %174 = math.exp %173 : vector<8x128xf32>
    %cst_74 = arith.constant 1.000000e+00 : f32
    %175 = vector.broadcast %cst_74 : f32 to vector<8x128xf32>
    %176 = arith.addf %175, %174 : vector<8x128xf32>
    %177 = arith.divf %175, %176 : vector<8x128xf32>
    %178 = vector.extract_strided_slice %171 {offsets = [0, 128], sizes = [8, 128], strides = [1, 1]} : vector<8x512xf32> to vector<8x128xf32>
    %179 = arith.negf %178 : vector<8x128xf32>
    %180 = math.exp %179 : vector<8x128xf32>
    %cst_75 = arith.constant 1.000000e+00 : f32
    %181 = vector.broadcast %cst_75 : f32 to vector<8x128xf32>
    %182 = arith.addf %181, %180 : vector<8x128xf32>
    %183 = arith.divf %181, %182 : vector<8x128xf32>
    %184 = vector.extract_strided_slice %171 {offsets = [0, 256], sizes = [8, 128], strides = [1, 1]} : vector<8x512xf32> to vector<8x128xf32>
    %185 = math.tanh %184 : vector<8x128xf32>
    %186 = vector.extract_strided_slice %171 {offsets = [0, 384], sizes = [8, 128], strides = [1, 1]} : vector<8x512xf32> to vector<8x128xf32>
    %187 = arith.negf %186 : vector<8x128xf32>
    %188 = math.exp %187 : vector<8x128xf32>
    %cst_76 = arith.constant 1.000000e+00 : f32
    %189 = vector.broadcast %cst_76 : f32 to vector<8x128xf32>
    %190 = arith.addf %189, %188 : vector<8x128xf32>
    %191 = arith.divf %189, %190 : vector<8x128xf32>
    %192 = arith.mulf %183, %163 : vector<8x128xf32>
    %193 = arith.mulf %177, %185 : vector<8x128xf32>
    %194 = arith.addf %192, %193 : vector<8x128xf32>
    %195 = math.tanh %194 : vector<8x128xf32>
    %196 = arith.mulf %191, %195 : vector<8x128xf32>
    %197 = arith.select %161, %196, %162 : vector<8x128xi1>, vector<8x128xf32>
    %c0_77 = arith.constant 0 : index
    %c0_78 = arith.constant 0 : index
    %198 = vector.load %arg10[%c0_77, %c0_78] : memref<8x128xf32, #tpu.memory_space<vmem>>, vector<8x128xf32>
    tpu.vector_store %arg10[%c0_77, %c0_78], %197 {strides = array<i32>} : memref<8x128xf32, #tpu.memory_space<vmem>>, vector<8x128xf32>,
    %199 = arith.select %161, %194, %163 : vector<8x128xi1>, vector<8x128xf32>
    %c0_79 = arith.constant 0 : index
    %c0_80 = arith.constant 0 : index
    %200 = vector.load %arg11[%c0_79, %c0_80] : memref<8x128xf32, #tpu.memory_space<vmem>>, vector<8x128xf32>
    tpu.vector_store %arg11[%c0_79, %c0_80], %199 {strides = array<i32>} : memref<8x128xf32, #tpu.memory_space<vmem>>, vector<8x128xf32>,
    %cst_81 = arith.constant 0.000000e+00 : f32
    %201 = vector.broadcast %cst_81 : f32 to vector<8x128xf32>
    %202 = arith.select %161, %196, %201 : vector<8x128xi1>, vector<8x128xf32>
    %203 = arith.truncf %202 : vector<8x128xf32> to vector<8x128xbf16>
    %204 = arith.index_cast %156 : i32 to index
    %c0_82 = arith.constant 0 : index
    %c0_83 = arith.constant 0 : index
    %205 = vector.load %arg7[%204, %c0_82, %c0_83] : memref<4x8x128xbf16, #tpu.memory_space<vmem>>, vector<1x8x128xbf16>
    %206 = vector.shape_cast %205 : vector<1x8x128xbf16> to vector<8x128xbf16>
    %207 = vector.shape_cast %203 : vector<8x128xbf16> to vector<1x8x128xbf16>
    tpu.vector_store %arg7[%204, %c0_82, %c0_83], %207 {strides = array<i32>} : memref<4x8x128xbf16, #tpu.memory_space<vmem>>, vector<1x8x128xbf16>,
    %c2_i32 = arith.constant 2 : i32
    %c4_i32_84 = arith.constant 4 : i32
    %208 = arith.muli %arg0, %c4_i32_84 : i32
    %209 = arith.addi %208, %c2_i32 : i32
    %210 = vector.broadcast %209 : i32 to vector<8x128xi32>
    %211 = arith.cmpi slt, %210, %3 : vector<8x128xi32>
    %c0_85 = arith.constant 0 : index
    %c0_86 = arith.constant 0 : index
    %212 = vector.load %arg8[%c0_85, %c0_86] : memref<8x128xf32, #tpu.memory_space<vmem>>, vector<8x128xf32>
    %c0_87 = arith.constant 0 : index
    %c0_88 = arith.constant 0 : index
    %213 = vector.load %arg9[%c0_87, %c0_88] : memref<8x128xf32, #tpu.memory_space<vmem>>, vector<8x128xf32>
    %214 = arith.index_cast %c2_i32 : i32 to index
    %c0_89 = arith.constant 0 : index
    %c0_90 = arith.constant 0 : index
    %215 = vector.load %arg2[%214, %c0_89, %c0_90] : memref<4x8x512xbf16, #tpu.memory_space<vmem>>, vector<1x8x512xbf16>
    %216 = vector.shape_cast %215 : vector<1x8x512xbf16> to vector<8x512xbf16>
    %217 = arith.extf %216 : vector<8x512xbf16> to vector<8x512xf32>
    %218 = arith.truncf %212 : vector<8x128xf32> to vector<8x128xbf16>
    %c0_91 = arith.constant 0 : index
    %c0_92 = arith.constant 0 : index
    %219 = vector.load %arg4[%c0_91, %c0_92] : memref<128x512xbf16, #tpu.memory_space<vmem>>, vector<128x512xbf16>
    %cst_93 = arith.constant dense<0.000000e+00> : vector<8x512xf32>
    %220 = tpu.matmul %218, %219, %cst_93 {dimension_numbers = #tpu.dot_dimension_numbers<[1], [0], [0], [1], [0, 0, 1, 1], [], []>} : vector<8x128xbf16>, vector<128x512xbf16>, vector<8x512xf32> -> vector<8x512xf32>
    %221 = arith.addf %217, %220 : vector<8x512xf32>
    %222 = vector.extract_strided_slice %221 {offsets = [0, 0], sizes = [8, 128], strides = [1, 1]} : vector<8x512xf32> to vector<8x128xf32>
    %223 = arith.negf %222 : vector<8x128xf32>
    %224 = math.exp %223 : vector<8x128xf32>
    %cst_94 = arith.constant 1.000000e+00 : f32
    %225 = vector.broadcast %cst_94 : f32 to vector<8x128xf32>
    %226 = arith.addf %225, %224 : vector<8x128xf32>
    %227 = arith.divf %225, %226 : vector<8x128xf32>
    %228 = vector.extract_strided_slice %221 {offsets = [0, 128], sizes = [8, 128], strides = [1, 1]} : vector<8x512xf32> to vector<8x128xf32>
    %229 = arith.negf %228 : vector<8x128xf32>
    %230 = math.exp %229 : vector<8x128xf32>
    %cst_95 = arith.constant 1.000000e+00 : f32
    %231 = vector.broadcast %cst_95 : f32 to vector<8x128xf32>
    %232 = arith.addf %231, %230 : vector<8x128xf32>
    %233 = arith.divf %231, %232 : vector<8x128xf32>
    %234 = vector.extract_strided_slice %221 {offsets = [0, 256], sizes = [8, 128], strides = [1, 1]} : vector<8x512xf32> to vector<8x128xf32>
    %235 = math.tanh %234 : vector<8x128xf32>
    %236 = vector.extract_strided_slice %221 {offsets = [0, 384], sizes = [8, 128], strides = [1, 1]} : vector<8x512xf32> to vector<8x128xf32>
    %237 = arith.negf %236 : vector<8x128xf32>
    %238 = math.exp %237 : vector<8x128xf32>
    %cst_96 = arith.constant 1.000000e+00 : f32
    %239 = vector.broadcast %cst_96 : f32 to vector<8x128xf32>
    %240 = arith.addf %239, %238 : vector<8x128xf32>
    %241 = arith.divf %239, %240 : vector<8x128xf32>
    %242 = arith.mulf %233, %213 : vector<8x128xf32>
    %243 = arith.mulf %227, %235 : vector<8x128xf32>
    %244 = arith.addf %242, %243 : vector<8x128xf32>
    %245 = math.tanh %244 : vector<8x128xf32>
    %246 = arith.mulf %241, %245 : vector<8x128xf32>
    %247 = arith.select %211, %246, %212 : vector<8x128xi1>, vector<8x128xf32>
    %c0_97 = arith.constant 0 : index
    %c0_98 = arith.constant 0 : index
    %248 = vector.load %arg8[%c0_97, %c0_98] : memref<8x128xf32, #tpu.memory_space<vmem>>, vector<8x128xf32>
    tpu.vector_store %arg8[%c0_97, %c0_98], %247 {strides = array<i32>} : memref<8x128xf32, #tpu.memory_space<vmem>>, vector<8x128xf32>,
    %249 = arith.select %211, %244, %213 : vector<8x128xi1>, vector<8x128xf32>
    %c0_99 = arith.constant 0 : index
    %c0_100 = arith.constant 0 : index
    %250 = vector.load %arg9[%c0_99, %c0_100] : memref<8x128xf32, #tpu.memory_space<vmem>>, vector<8x128xf32>
    tpu.vector_store %arg9[%c0_99, %c0_100], %249 {strides = array<i32>} : memref<8x128xf32, #tpu.memory_space<vmem>>, vector<8x128xf32>,
    %cst_101 = arith.constant 0.000000e+00 : f32
    %251 = vector.broadcast %cst_101 : f32 to vector<8x128xf32>
    %252 = arith.select %211, %246, %251 : vector<8x128xi1>, vector<8x128xf32>
    %253 = arith.truncf %252 : vector<8x128xf32> to vector<8x128xbf16>
    %254 = arith.index_cast %c2_i32 : i32 to index
    %c0_102 = arith.constant 0 : index
    %c0_103 = arith.constant 0 : index
    %255 = vector.load %arg6[%254, %c0_102, %c0_103] : memref<4x8x128xbf16, #tpu.memory_space<vmem>>, vector<1x8x128xbf16>
    %256 = vector.shape_cast %255 : vector<1x8x128xbf16> to vector<8x128xbf16>
    %257 = vector.shape_cast %253 : vector<8x128xbf16> to vector<1x8x128xbf16>
    tpu.vector_store %arg6[%254, %c0_102, %c0_103], %257 {strides = array<i32>} : memref<4x8x128xbf16, #tpu.memory_space<vmem>>, vector<1x8x128xbf16>,
    %c3_i32_104 = arith.constant 3 : i32
    %258 = arith.subi %c3_i32_104, %c2_i32 : i32
    %c1_i32_105 = arith.constant 1 : i32
    %259 = arith.subi %c1_i32_105, %arg0 : i32
    %c4_i32_106 = arith.constant 4 : i32
    %260 = arith.muli %259, %c4_i32_106 : i32
    %261 = arith.addi %260, %258 : i32
    %262 = vector.broadcast %261 : i32 to vector<8x128xi32>
    %263 = arith.cmpi slt, %262, %3 : vector<8x128xi32>
    %c0_107 = arith.constant 0 : index
    %c0_108 = arith.constant 0 : index
    %264 = vector.load %arg10[%c0_107, %c0_108] : memref<8x128xf32, #tpu.memory_space<vmem>>, vector<8x128xf32>
    %c0_109 = arith.constant 0 : index
    %c0_110 = arith.constant 0 : index
    %265 = vector.load %arg11[%c0_109, %c0_110] : memref<8x128xf32, #tpu.memory_space<vmem>>, vector<8x128xf32>
    %266 = arith.index_cast %258 : i32 to index
    %c0_111 = arith.constant 0 : index
    %c0_112 = arith.constant 0 : index
    %267 = vector.load %arg3[%266, %c0_111, %c0_112] : memref<4x8x512xbf16, #tpu.memory_space<vmem>>, vector<1x8x512xbf16>
    %268 = vector.shape_cast %267 : vector<1x8x512xbf16> to vector<8x512xbf16>
    %269 = arith.extf %268 : vector<8x512xbf16> to vector<8x512xf32>
    %270 = arith.truncf %264 : vector<8x128xf32> to vector<8x128xbf16>
    %c0_113 = arith.constant 0 : index
    %c0_114 = arith.constant 0 : index
    %271 = vector.load %arg5[%c0_113, %c0_114] : memref<128x512xbf16, #tpu.memory_space<vmem>>, vector<128x512xbf16>
    %cst_115 = arith.constant dense<0.000000e+00> : vector<8x512xf32>
    %272 = tpu.matmul %270, %271, %cst_115 {dimension_numbers = #tpu.dot_dimension_numbers<[1], [0], [0], [1], [0, 0, 1, 1], [], []>} : vector<8x128xbf16>, vector<128x512xbf16>, vector<8x512xf32> -> vector<8x512xf32>
    %273 = arith.addf %269, %272 : vector<8x512xf32>
    %274 = vector.extract_strided_slice %273 {offsets = [0, 0], sizes = [8, 128], strides = [1, 1]} : vector<8x512xf32> to vector<8x128xf32>
    %275 = arith.negf %274 : vector<8x128xf32>
    %276 = math.exp %275 : vector<8x128xf32>
    %cst_116 = arith.constant 1.000000e+00 : f32
    %277 = vector.broadcast %cst_116 : f32 to vector<8x128xf32>
    %278 = arith.addf %277, %276 : vector<8x128xf32>
    %279 = arith.divf %277, %278 : vector<8x128xf32>
    %280 = vector.extract_strided_slice %273 {offsets = [0, 128], sizes = [8, 128], strides = [1, 1]} : vector<8x512xf32> to vector<8x128xf32>
    %281 = arith.negf %280 : vector<8x128xf32>
    %282 = math.exp %281 : vector<8x128xf32>
    %cst_117 = arith.constant 1.000000e+00 : f32
    %283 = vector.broadcast %cst_117 : f32 to vector<8x128xf32>
    %284 = arith.addf %283, %282 : vector<8x128xf32>
    %285 = arith.divf %283, %284 : vector<8x128xf32>
    %286 = vector.extract_strided_slice %273 {offsets = [0, 256], sizes = [8, 128], strides = [1, 1]} : vector<8x512xf32> to vector<8x128xf32>
    %287 = math.tanh %286 : vector<8x128xf32>
    %288 = vector.extract_strided_slice %273 {offsets = [0, 384], sizes = [8, 128], strides = [1, 1]} : vector<8x512xf32> to vector<8x128xf32>
    %289 = arith.negf %288 : vector<8x128xf32>
    %290 = math.exp %289 : vector<8x128xf32>
    %cst_118 = arith.constant 1.000000e+00 : f32
    %291 = vector.broadcast %cst_118 : f32 to vector<8x128xf32>
    %292 = arith.addf %291, %290 : vector<8x128xf32>
    %293 = arith.divf %291, %292 : vector<8x128xf32>
    %294 = arith.mulf %285, %265 : vector<8x128xf32>
    %295 = arith.mulf %279, %287 : vector<8x128xf32>
    %296 = arith.addf %294, %295 : vector<8x128xf32>
    %297 = math.tanh %296 : vector<8x128xf32>
    %298 = arith.mulf %293, %297 : vector<8x128xf32>
    %299 = arith.select %263, %298, %264 : vector<8x128xi1>, vector<8x128xf32>
    %c0_119 = arith.constant 0 : index
    %c0_120 = arith.constant 0 : index
    %300 = vector.load %arg10[%c0_119, %c0_120] : memref<8x128xf32, #tpu.memory_space<vmem>>, vector<8x128xf32>
    tpu.vector_store %arg10[%c0_119, %c0_120], %299 {strides = array<i32>} : memref<8x128xf32, #tpu.memory_space<vmem>>, vector<8x128xf32>,
    %301 = arith.select %263, %296, %265 : vector<8x128xi1>, vector<8x128xf32>
    %c0_121 = arith.constant 0 : index
    %c0_122 = arith.constant 0 : index
    %302 = vector.load %arg11[%c0_121, %c0_122] : memref<8x128xf32, #tpu.memory_space<vmem>>, vector<8x128xf32>
    tpu.vector_store %arg11[%c0_121, %c0_122], %301 {strides = array<i32>} : memref<8x128xf32, #tpu.memory_space<vmem>>, vector<8x128xf32>,
    %cst_123 = arith.constant 0.000000e+00 : f32
    %303 = vector.broadcast %cst_123 : f32 to vector<8x128xf32>
    %304 = arith.select %263, %298, %303 : vector<8x128xi1>, vector<8x128xf32>
    %305 = arith.truncf %304 : vector<8x128xf32> to vector<8x128xbf16>
    %306 = arith.index_cast %258 : i32 to index
    %c0_124 = arith.constant 0 : index
    %c0_125 = arith.constant 0 : index
    %307 = vector.load %arg7[%306, %c0_124, %c0_125] : memref<4x8x128xbf16, #tpu.memory_space<vmem>>, vector<1x8x128xbf16>
    %308 = vector.shape_cast %307 : vector<1x8x128xbf16> to vector<8x128xbf16>
    %309 = vector.shape_cast %305 : vector<8x128xbf16> to vector<1x8x128xbf16>
    tpu.vector_store %arg7[%306, %c0_124, %c0_125], %309 {strides = array<i32>} : memref<4x8x128xbf16, #tpu.memory_space<vmem>>, vector<1x8x128xbf16>,
    %c3_i32_126 = arith.constant 3 : i32
    %c4_i32_127 = arith.constant 4 : i32
    %310 = arith.muli %arg0, %c4_i32_127 : i32
    %311 = arith.addi %310, %c3_i32_126 : i32
    %312 = vector.broadcast %311 : i32 to vector<8x128xi32>
    %313 = arith.cmpi slt, %312, %3 : vector<8x128xi32>
    %c0_128 = arith.constant 0 : index
    %c0_129 = arith.constant 0 : index
    %314 = vector.load %arg8[%c0_128, %c0_129] : memref<8x128xf32, #tpu.memory_space<vmem>>, vector<8x128xf32>
    %c0_130 = arith.constant 0 : index
    %c0_131 = arith.constant 0 : index
    %315 = vector.load %arg9[%c0_130, %c0_131] : memref<8x128xf32, #tpu.memory_space<vmem>>, vector<8x128xf32>
    %316 = arith.index_cast %c3_i32_126 : i32 to index
    %c0_132 = arith.constant 0 : index
    %c0_133 = arith.constant 0 : index
    %317 = vector.load %arg2[%316, %c0_132, %c0_133] : memref<4x8x512xbf16, #tpu.memory_space<vmem>>, vector<1x8x512xbf16>
    %318 = vector.shape_cast %317 : vector<1x8x512xbf16> to vector<8x512xbf16>
    %319 = arith.extf %318 : vector<8x512xbf16> to vector<8x512xf32>
    %320 = arith.truncf %314 : vector<8x128xf32> to vector<8x128xbf16>
    %c0_134 = arith.constant 0 : index
    %c0_135 = arith.constant 0 : index
    %321 = vector.load %arg4[%c0_134, %c0_135] : memref<128x512xbf16, #tpu.memory_space<vmem>>, vector<128x512xbf16>
    %cst_136 = arith.constant dense<0.000000e+00> : vector<8x512xf32>
    %322 = tpu.matmul %320, %321, %cst_136 {dimension_numbers = #tpu.dot_dimension_numbers<[1], [0], [0], [1], [0, 0, 1, 1], [], []>} : vector<8x128xbf16>, vector<128x512xbf16>, vector<8x512xf32> -> vector<8x512xf32>
    %323 = arith.addf %319, %322 : vector<8x512xf32>
    %324 = vector.extract_strided_slice %323 {offsets = [0, 0], sizes = [8, 128], strides = [1, 1]} : vector<8x512xf32> to vector<8x128xf32>
    %325 = arith.negf %324 : vector<8x128xf32>
    %326 = math.exp %325 : vector<8x128xf32>
    %cst_137 = arith.constant 1.000000e+00 : f32
    %327 = vector.broadcast %cst_137 : f32 to vector<8x128xf32>
    %328 = arith.addf %327, %326 : vector<8x128xf32>
    %329 = arith.divf %327, %328 : vector<8x128xf32>
    %330 = vector.extract_strided_slice %323 {offsets = [0, 128], sizes = [8, 128], strides = [1, 1]} : vector<8x512xf32> to vector<8x128xf32>
    %331 = arith.negf %330 : vector<8x128xf32>
    %332 = math.exp %331 : vector<8x128xf32>
    %cst_138 = arith.constant 1.000000e+00 : f32
    %333 = vector.broadcast %cst_138 : f32 to vector<8x128xf32>
    %334 = arith.addf %333, %332 : vector<8x128xf32>
    %335 = arith.divf %333, %334 : vector<8x128xf32>
    %336 = vector.extract_strided_slice %323 {offsets = [0, 256], sizes = [8, 128], strides = [1, 1]} : vector<8x512xf32> to vector<8x128xf32>
    %337 = math.tanh %336 : vector<8x128xf32>
    %338 = vector.extract_strided_slice %323 {offsets = [0, 384], sizes = [8, 128], strides = [1, 1]} : vector<8x512xf32> to vector<8x128xf32>
    %339 = arith.negf %338 : vector<8x128xf32>
    %340 = math.exp %339 : vector<8x128xf32>
    %cst_139 = arith.constant 1.000000e+00 : f32
    %341 = vector.broadcast %cst_139 : f32 to vector<8x128xf32>
    %342 = arith.addf %341, %340 : vector<8x128xf32>
    %343 = arith.divf %341, %342 : vector<8x128xf32>
    %344 = arith.mulf %335, %315 : vector<8x128xf32>
    %345 = arith.mulf %329, %337 : vector<8x128xf32>
    %346 = arith.addf %344, %345 : vector<8x128xf32>
    %347 = math.tanh %346 : vector<8x128xf32>
    %348 = arith.mulf %343, %347 : vector<8x128xf32>
    %349 = arith.select %313, %348, %314 : vector<8x128xi1>, vector<8x128xf32>
    %c0_140 = arith.constant 0 : index
    %c0_141 = arith.constant 0 : index
    %350 = vector.load %arg8[%c0_140, %c0_141] : memref<8x128xf32, #tpu.memory_space<vmem>>, vector<8x128xf32>
    tpu.vector_store %arg8[%c0_140, %c0_141], %349 {strides = array<i32>} : memref<8x128xf32, #tpu.memory_space<vmem>>, vector<8x128xf32>,
    %351 = arith.select %313, %346, %315 : vector<8x128xi1>, vector<8x128xf32>
    %c0_142 = arith.constant 0 : index
    %c0_143 = arith.constant 0 : index
    %352 = vector.load %arg9[%c0_142, %c0_143] : memref<8x128xf32, #tpu.memory_space<vmem>>, vector<8x128xf32>
    tpu.vector_store %arg9[%c0_142, %c0_143], %351 {strides = array<i32>} : memref<8x128xf32, #tpu.memory_space<vmem>>, vector<8x128xf32>,
    %cst_144 = arith.constant 0.000000e+00 : f32
    %353 = vector.broadcast %cst_144 : f32 to vector<8x128xf32>
    %354 = arith.select %313, %348, %353 : vector<8x128xi1>, vector<8x128xf32>
    %355 = arith.truncf %354 : vector<8x128xf32> to vector<8x128xbf16>
    %356 = arith.index_cast %c3_i32_126 : i32 to index
    %c0_145 = arith.constant 0 : index
    %c0_146 = arith.constant 0 : index
    %357 = vector.load %arg6[%356, %c0_145, %c0_146] : memref<4x8x128xbf16, #tpu.memory_space<vmem>>, vector<1x8x128xbf16>
    %358 = vector.shape_cast %357 : vector<1x8x128xbf16> to vector<8x128xbf16>
    %359 = vector.shape_cast %355 : vector<8x128xbf16> to vector<1x8x128xbf16>
    tpu.vector_store %arg6[%356, %c0_145, %c0_146], %359 {strides = array<i32>} : memref<4x8x128xbf16, #tpu.memory_space<vmem>>, vector<1x8x128xbf16>,
    %c3_i32_147 = arith.constant 3 : i32
    %360 = arith.subi %c3_i32_147, %c3_i32_126 : i32
    %c1_i32_148 = arith.constant 1 : i32
    %361 = arith.subi %c1_i32_148, %arg0 : i32
    %c4_i32_149 = arith.constant 4 : i32
    %362 = arith.muli %361, %c4_i32_149 : i32
    %363 = arith.addi %362, %360 : i32
    %364 = vector.broadcast %363 : i32 to vector<8x128xi32>
    %365 = arith.cmpi slt, %364, %3 : vector<8x128xi32>
    %c0_150 = arith.constant 0 : index
    %c0_151 = arith.constant 0 : index
    %366 = vector.load %arg10[%c0_150, %c0_151] : memref<8x128xf32, #tpu.memory_space<vmem>>, vector<8x128xf32>
    %c0_152 = arith.constant 0 : index
    %c0_153 = arith.constant 0 : index
    %367 = vector.load %arg11[%c0_152, %c0_153] : memref<8x128xf32, #tpu.memory_space<vmem>>, vector<8x128xf32>
    %368 = arith.index_cast %360 : i32 to index
    %c0_154 = arith.constant 0 : index
    %c0_155 = arith.constant 0 : index
    %369 = vector.load %arg3[%368, %c0_154, %c0_155] : memref<4x8x512xbf16, #tpu.memory_space<vmem>>, vector<1x8x512xbf16>
    %370 = vector.shape_cast %369 : vector<1x8x512xbf16> to vector<8x512xbf16>
    %371 = arith.extf %370 : vector<8x512xbf16> to vector<8x512xf32>
    %372 = arith.truncf %366 : vector<8x128xf32> to vector<8x128xbf16>
    %c0_156 = arith.constant 0 : index
    %c0_157 = arith.constant 0 : index
    %373 = vector.load %arg5[%c0_156, %c0_157] : memref<128x512xbf16, #tpu.memory_space<vmem>>, vector<128x512xbf16>
    %cst_158 = arith.constant dense<0.000000e+00> : vector<8x512xf32>
    %374 = tpu.matmul %372, %373, %cst_158 {dimension_numbers = #tpu.dot_dimension_numbers<[1], [0], [0], [1], [0, 0, 1, 1], [], []>} : vector<8x128xbf16>, vector<128x512xbf16>, vector<8x512xf32> -> vector<8x512xf32>
    %375 = arith.addf %371, %374 : vector<8x512xf32>
    %376 = vector.extract_strided_slice %375 {offsets = [0, 0], sizes = [8, 128], strides = [1, 1]} : vector<8x512xf32> to vector<8x128xf32>
    %377 = arith.negf %376 : vector<8x128xf32>
    %378 = math.exp %377 : vector<8x128xf32>
    %cst_159 = arith.constant 1.000000e+00 : f32
    %379 = vector.broadcast %cst_159 : f32 to vector<8x128xf32>
    %380 = arith.addf %379, %378 : vector<8x128xf32>
    %381 = arith.divf %379, %380 : vector<8x128xf32>
    %382 = vector.extract_strided_slice %375 {offsets = [0, 128], sizes = [8, 128], strides = [1, 1]} : vector<8x512xf32> to vector<8x128xf32>
    %383 = arith.negf %382 : vector<8x128xf32>
    %384 = math.exp %383 : vector<8x128xf32>
    %cst_160 = arith.constant 1.000000e+00 : f32
    %385 = vector.broadcast %cst_160 : f32 to vector<8x128xf32>
    %386 = arith.addf %385, %384 : vector<8x128xf32>
    %387 = arith.divf %385, %386 : vector<8x128xf32>
    %388 = vector.extract_strided_slice %375 {offsets = [0, 256], sizes = [8, 128], strides = [1, 1]} : vector<8x512xf32> to vector<8x128xf32>
    %389 = math.tanh %388 : vector<8x128xf32>
    %390 = vector.extract_strided_slice %375 {offsets = [0, 384], sizes = [8, 128], strides = [1, 1]} : vector<8x512xf32> to vector<8x128xf32>
    %391 = arith.negf %390 : vector<8x128xf32>
    %392 = math.exp %391 : vector<8x128xf32>
    %cst_161 = arith.constant 1.000000e+00 : f32
    %393 = vector.broadcast %cst_161 : f32 to vector<8x128xf32>
    %394 = arith.addf %393, %392 : vector<8x128xf32>
    %395 = arith.divf %393, %394 : vector<8x128xf32>
    %396 = arith.mulf %387, %367 : vector<8x128xf32>
    %397 = arith.mulf %381, %389 : vector<8x128xf32>
    %398 = arith.addf %396, %397 : vector<8x128xf32>
    %399 = math.tanh %398 : vector<8x128xf32>
    %400 = arith.mulf %395, %399 : vector<8x128xf32>
    %401 = arith.select %365, %400, %366 : vector<8x128xi1>, vector<8x128xf32>
    %c0_162 = arith.constant 0 : index
    %c0_163 = arith.constant 0 : index
    %402 = vector.load %arg10[%c0_162, %c0_163] : memref<8x128xf32, #tpu.memory_space<vmem>>, vector<8x128xf32>
    tpu.vector_store %arg10[%c0_162, %c0_163], %401 {strides = array<i32>} : memref<8x128xf32, #tpu.memory_space<vmem>>, vector<8x128xf32>,
    %403 = arith.select %365, %398, %367 : vector<8x128xi1>, vector<8x128xf32>
    %c0_164 = arith.constant 0 : index
    %c0_165 = arith.constant 0 : index
    %404 = vector.load %arg11[%c0_164, %c0_165] : memref<8x128xf32, #tpu.memory_space<vmem>>, vector<8x128xf32>
    tpu.vector_store %arg11[%c0_164, %c0_165], %403 {strides = array<i32>} : memref<8x128xf32, #tpu.memory_space<vmem>>, vector<8x128xf32>,
    %cst_166 = arith.constant 0.000000e+00 : f32
    %405 = vector.broadcast %cst_166 : f32 to vector<8x128xf32>
    %406 = arith.select %365, %400, %405 : vector<8x128xi1>, vector<8x128xf32>
    %407 = arith.truncf %406 : vector<8x128xf32> to vector<8x128xbf16>
    %408 = arith.index_cast %360 : i32 to index
    %c0_167 = arith.constant 0 : index
    %c0_168 = arith.constant 0 : index
    %409 = vector.load %arg7[%408, %c0_167, %c0_168] : memref<4x8x128xbf16, #tpu.memory_space<vmem>>, vector<1x8x128xbf16>
    %410 = vector.shape_cast %409 : vector<1x8x128xbf16> to vector<8x128xbf16>
    %411 = vector.shape_cast %407 : vector<8x128xbf16> to vector<1x8x128xbf16>
    tpu.vector_store %arg7[%408, %c0_167, %c0_168], %411 {strides = array<i32>} : memref<4x8x128xbf16, #tpu.memory_space<vmem>>, vector<1x8x128xbf16>,
    %c4_i32_169 = arith.constant 4 : i32
    return
  }
  func.func @transform_0(%arg0: i32) -> (i32, i32) {
    %c0_i32 = arith.constant 0 : i32
    %c0_i32_0 = arith.constant 0 : i32
    %c0_i32_1 = arith.constant 0 : i32
    return %c0_i32, %c0_i32_0 : i32, i32
  }
  func.func @transform_1(%arg0: i32) -> (i32, i32, i32) {
    %c0_i32 = arith.constant 0 : i32
    %c0_i32_0 = arith.constant 0 : i32
    %c0_i32_1 = arith.constant 0 : i32
    return %arg0, %c0_i32, %c0_i32_0 : i32, i32, i32
  }
  func.func @transform_2(%arg0: i32) -> (i32, i32, i32) {
    %c1_i32 = arith.constant 1 : i32
    %0 = arith.subi %c1_i32, %arg0 : i32
    %c0_i32 = arith.constant 0 : i32
    %c0_i32_0 = arith.constant 0 : i32
    %c0_i32_1 = arith.constant 0 : i32
    return %0, %c0_i32, %c0_i32_0 : i32, i32, i32
  }
  func.func @transform_3(%arg0: i32) -> (i32, i32) {
    %c0_i32 = arith.constant 0 : i32
    %c0_i32_0 = arith.constant 0 : i32
    %c0_i32_1 = arith.constant 0 : i32
    return %c0_i32, %c0_i32_0 : i32, i32
  }
  func.func @transform_4(%arg0: i32) -> (i32, i32) {
    %c0_i32 = arith.constant 0 : i32
    %c0_i32_0 = arith.constant 0 : i32
    %c0_i32_1 = arith.constant 0 : i32
    return %c0_i32, %c0_i32_0 : i32, i32
  }
  func.func @transform_5(%arg0: i32) -> (i32, i32, i32) {
    %c0_i32 = arith.constant 0 : i32
    %c0_i32_0 = arith.constant 0 : i32
    %c0_i32_1 = arith.constant 0 : i32
    return %arg0, %c0_i32, %c0_i32_0 : i32, i32, i32
  }
  func.func @transform_6(%arg0: i32) -> (i32, i32, i32) {
    %c1_i32 = arith.constant 1 : i32
    %0 = arith.subi %c1_i32, %arg0 : i32
    %c0_i32 = arith.constant 0 : i32
    %c0_i32_0 = arith.constant 0 : i32
    %c0_i32_1 = arith.constant 0 : i32
    return %0, %c0_i32, %c0_i32_0 : i32, i32, i32
  }
}

</mosaic_0001>

<bundles_post_ra>
// kernel: inference_composition.2
= control target key start
LH: loop header
LB: loop body
LE: loop exit
PB: predicated region body
PF: predicated region fallthrough
CT: control target
= control target key end

     0   :  { %s3701_s21 = smov 0   ;;  %s4805_s0 = inlined_call_operand.vmem [shape: s32[8,128], index: 0, kind: input, shape index: {}]   ;;  %s4806_s1 = inlined_call_operand.vmem [shape: bf16[8,8,512], index: 1, kind: input, shape index: {}]   ;;  %s4807_s2 = inlined_call_operand.vmem [shape: bf16[8,8,512], index: 2, kind: input, shape index: {}]   ;;  %s4808_s3 = inlined_call_operand.vmem [shape: bf16[128,512], index: 3, kind: input, shape index: {}]   ;;  %s4809_s4 = inlined_call_operand.vmem [shape: bf16[128,512], index: 4, kind: input, shape index: {}]   ;;  %s4810_s5 = inlined_call_operand.vmem [shape: bf16[8,8,128], index: 5, kind: output, shape index: {0}]   ;;  %s4811_s6 = inlined_call_operand.vmem [shape: bf16[8,8,128], index: 6, kind: output, shape index: {1}]  }
   0x1 LB: > { %s3005_s22 = sadd.s32 4294967295, %s3662_s21   ;;  %p3009_p0 = scmp.ge.s32.totalorder %s3662_s21, 1  ;;  %s3662_s21 = sphi %s3701_s21, %s17_s21  }
   0x2   : > { %p235_p1 = scmp.lt.s32.totalorder %s3662_s21, 3 }
   0x4   : > { %p236_p2 = pnand %p3009_p0, %p235_p1 }
   0x6   : > { %239 = sbr.rel (%p236_p2) target bundleno = 1139 (0x473), region = 40 }
   0xd   : > { %s3709_s23 = sshll.u32 %s3005_s22, 2  ;;  %s286_s24 = ssub.s32 1, %s3005_s22 }
   0xe   : > { %p280_p3 = scmp.lt.s32.totalorder %s3709_s23, 7  ;;  %s3712_s25 = sshll.u32 %s286_s24, 2 }
   0xf   : > { %p288_p4 = scmp.lt.s32.totalorder %s3712_s25, 7  ;;  %p3020_p5 = scmp.ne.s32.totalorder %s3005_s22, 0 }
  0x10   : > { %s281_s26 = scalar_select %p280_p3, %s3709_s23, 7 }
  0x11   : > { %s289_s27 = scalar_select %p288_p4, %s3712_s25, 7 }
  0x12   : > { %s3323_s28 = sshll.u32 %s281_s26, 4  ;;  %s3017_s29 = sshll.u32 %s281_s26, 2  ;;  %v3664_v0 = vmov (!%p3020_p5), 0.0  }
  0x13   : > { %s3720_s8 = scalar_lea.vmem %s4806_s1, %s3323_s28  ;;  %s3324_s9 = sshll.u32 %s289_s27, 4  ;;  %314 = vst [vmem:[#allocation2] sm:$0xff] (!%p3020_p5), %v3664_v0  ;;  %315 = vst [vmem:[#allocation3] sm:$0xff] (!%p3020_p5), %v3664_v0 }
  0x14   : > { %s3725_s12 = scalar_lea.vmem %s4807_s2, %s3324_s9  ;;  %s3730_s15 = scalar_lea.vmem %s4810_s5, %s3017_s29  ;;  %316 = vst [vmem:[#allocation4] sm:$0xff] (!%p3020_p5), %v3664_v0  ;;  %317 = vst [vmem:[#allocation5] sm:$0xff] (!%p3020_p5), %v3664_v0 }
  0x15   : > { %s3019_s16 = sshll.u32 %s289_s27, 2  ;;  %313 = sbr.rel (%p3020_p5) target bundleno = 28 (0x1c), region = 44 }
  0x16   : > { %s3735_s19 = scalar_lea.vmem %s4811_s6, %s3019_s16 }
  0x1c PF: > { %v3740_v1 = vld [vmem:[%s4808_s3 + $0x4] ss:$16 sps:$4 sm:$0xff]   ;;  %v3745_v2 = vld [vmem:[%s4808_s3] ss:$16 sps:$4 sm:$0xff]   ;;  %v4812_v3 = vmov 0   ;;  %s642_s11 = sadd.s32 3, %s3712_s25 }
  0x1d   : > { %555 = vmatprep.mubr.bf16.mxu0 %v4812_v3  ;;  %596 = vmatprep.mubr.bf16.mxu1 %v4812_v3  ;;  %v3753_v4 = vld [vmem:[%s4808_s3 + $0x24] ss:$16 sps:$4 sm:$0xff]   ;;  %v3759_v5 = vld [vmem:[%s4808_s3 + $0x20] ss:$16 sps:$4 sm:$0xff]   ;;  %v3770_v7 = vld [vmem:[%s4808_s3 + $0xc] ss:$16 sps:$4 sm:$0xff]  }
  0x1e   : > { %523 = vmatprep.subr.bf16.mxu0 %v3740_v1  ;;  %v3765_v6 = vld [vmem:[%s4808_s3 + $0x44] ss:$16 sps:$4 sm:$0xff]   ;;  %v3775_v8 = vld [vmem:[%s4808_s3 + $0x8] ss:$16 sps:$4 sm:$0xff]   ;;  %v3781_v9 = vld [vmem:[%s4808_s3 + $0x40] ss:$16 sps:$4 sm:$0xff]   ;;  %564 = vmatprep.subr.bf16.mxu1 %v3770_v7 }
  0x1f   : > { %524 = vmatpush1.bf16.msra.mxu0 %v3745_v2  ;;  %v3788_v10 = vld [vmem:[%s4808_s3 + $0x64] ss:$16 sps:$4 sm:$0xff]   ;;  %565 = vmatpush1.bf16.msra.mxu1 %v3775_v8  ;;  %v3794_v11 = vld [vmem:[%s4808_s3 + $0x2c] ss:$16 sps:$4 sm:$0xff]   ;;  %v3799_v12 = vld [vmem:[%s4808_s3 + $0x28] ss:$16 sps:$4 sm:$0xff]  }
  0x20   : > { %525 = vmatprep.subr.bf16.mxu0 %v3753_v4  ;;  %566 = vmatprep.subr.bf16.mxu1 %v3794_v11  ;;  %v3806_v13 = vld [vmem:[%s4808_s3 + $0x60] ss:$16 sps:$4 sm:$0xff]   ;;  %v3811_v14 = vld [vmem:[%s4808_s3 + $0x84] ss:$16 sps:$4 sm:$0xff]   ;;  %v3816_v15 = vld [vmem:[%s4808_s3 + $0x4c] ss:$16 sps:$4 sm:$0xff]  }
  0x21   : > { %v3823_v16 = vld [vmem:[%s4808_s3 + $0x48] ss:$16 sps:$4 sm:$0xff]   ;;  %v3829_v17 = vld [vmem:[%s4808_s3 + $0x6c] ss:$16 sps:$4 sm:$0xff]   ;;  %v3835_v18 = vld [vmem:[%s4808_s3 + $0x80] ss:$16 sps:$4 sm:$0xff]  }
  0x22   : > { %v3841_v19 = vld [vmem:[%s4808_s3 + $0xa4] ss:$16 sps:$4 sm:$0xff]   ;;  %v3847_v20 = vld [vmem:[%s4808_s3 + $0x68] ss:$16 sps:$4 sm:$0xff]   ;;  %v3853_v21 = vld [vmem:[%s4808_s3 + $0x8c] ss:$16 sps:$4 sm:$0xff]  }
  0x23   : > { %526 = vmatpush1.bf16.msra.mxu0 %v3759_v5  ;;  %567 = vmatpush1.bf16.msra.mxu1 %v3799_v12  ;;  %v3859_v22 = vld [vmem:[%s4808_s3 + $0xa0] ss:$16 sps:$4 sm:$0xff]   ;;  %v3864_v23 = vld [vmem:[%s4808_s3 + $0xc4] ss:$16 sps:$4 sm:$0xff]   ;;  %v3871_v24 = vld [vmem:[%s4808_s3 + $0x88] ss:$16 sps:$4 sm:$0xff]  }
  0x24   : > { %527 = vmatprep.subr.bf16.mxu0 %v3765_v6  ;;  %568 = vmatprep.subr.bf16.mxu1 %v3816_v15  ;;  %v3877_v25 = vld [vmem:[%s4808_s3 + $0xac] ss:$16 sps:$4 sm:$0xff]   ;;  %v3882_v26 = vld [vmem:[%s4808_s3 + $0xc0] ss:$16 sps:$4 sm:$0xff]   ;;  %v3888_v27 = vld [vmem:[%s4808_s3 + $0xe4] ss:$16 sps:$4 sm:$0xff]  }
  0x25   : > { %v3895_v28 = vld [vmem:[%s4808_s3 + $0xa8] ss:$16 sps:$4 sm:$0xff]   ;;  %v3901_v29 = vld [vmem:[%s4808_s3 + $0xcc] ss:$16 sps:$4 sm:$0xff]   ;;  %v3906_v30 = vld [vmem:[%s4808_s3 + $0xe0] ss:$16 sps:$4 sm:$0xff]  }
  0x26   : > { %v3908_v31 = vld [vmem:[#allocation2] sm:$0xff]  ;;  %v3921_v33 = vld [vmem:[%s4808_s3 + $0xc8] ss:$16 sps:$4 sm:$0xff]   ;;  %v3927_v34 = vld [vmem:[%s4808_s3 + $0xec] ss:$16 sps:$4 sm:$0xff]   ;;  %s965_s13 = sadd.s32 1, %s3709_s23 }
  0x27   : > { %528 = vmatpush1.bf16.msra.mxu0 %v3781_v9  ;;  %569 = vmatpush1.bf16.msra.mxu1 %v3823_v16  ;;  %v3914_v32 = vld [vmem:[%s4809_s4 + $0x4] ss:$16 sps:$4 sm:$0xff]   ;;  %v330_v35 = vpack.c.bf16 %v3908_v31, %v3908_v31  ;;  %v3934_v36 = vld [vmem:[%s4809_s4] ss:$16 sps:$4 sm:$0xff]   ;;  %v3947_v38 = vld [vmem:[%s4808_s3 + $0xe8] ss:$16 sps:$4 sm:$0xff]  }
  0x28   : > { %529 = vmatprep.subr.bf16.mxu0 %v3788_v10  ;;  %570 = vmatprep.subr.bf16.mxu1 %v3829_v17  ;;  %v3940_v37 = vld [vmem:[%s4809_s4 + $0x24] ss:$16 sps:$4 sm:$0xff]   ;;  %v3953_v39 = vld [vmem:[%s4809_s4 + $0xc] ss:$16 sps:$4 sm:$0xff]   ;;  %v3958_v40 = vld [vmem:[%s4809_s4 + $0x20] ss:$16 sps:$4 sm:$0xff]  }
  0x29   : > { %v3964_v41 = vld [vmem:[%s4809_s4 + $0x44] ss:$16 sps:$4 sm:$0xff]   ;;  %v3972_v42 = vld [vmem:[%s4809_s4 + $0x8] ss:$16 sps:$4 sm:$0xff]   ;;  %v3978_v43 = vld [vmem:[%s4809_s4 + $0x2c] ss:$16 sps:$4 sm:$0xff]  }
  0x2a   : > { %v3984_v44 = vld [vmem:[%s4809_s4 + $0x40] ss:$16 sps:$4 sm:$0xff]   ;;  %v3990_v45 = vld [vmem:[%s4809_s4 + $0x64] ss:$16 sps:$4 sm:$0xff]   ;;  %v3996_v46 = vld [vmem:[%s4809_s4 + $0x28] ss:$16 sps:$4 sm:$0xff]  }
  0x2b   : > { %530 = vmatpush1.bf16.msra.mxu0 %v3806_v13  ;;  %571 = vmatpush1.bf16.msra.mxu1 %v3847_v20  ;;  %v4001_v47 = vld [vmem:[%s4809_s4 + $0x60] ss:$16 sps:$4 sm:$0xff]   ;;  %v4007_v48 = vld [vmem:[%s4809_s4 + $0x4c] ss:$16 sps:$4 sm:$0xff]   ;;  %v4013_v49 = vld [vmem:[%s4809_s4 + $0x84] ss:$16 sps:$4 sm:$0xff]  }
  0x2c   : > { %531 = vmatprep.subr.bf16.mxu0 %v3811_v14  ;;  %572 = vmatprep.subr.bf16.mxu1 %v3853_v21  ;;  %v4019_v50 = vld [vmem:[%s4809_s4 + $0x48] ss:$16 sps:$4 sm:$0xff]   ;;  %v4024_v51 = vld [vmem:[%s4809_s4 + $0x6c] ss:$16 sps:$4 sm:$0xff]   ;;  %v4031_v52 = vld [vmem:[%s4809_s4 + $0x80] ss:$16 sps:$4 sm:$0xff]  }
  0x2d   : > { %v4037_v53 = vld [vmem:[%s4809_s4 + $0xa4] ss:$16 sps:$4 sm:$0xff]   ;;  %v4042_v54 = vld [vmem:[%s4809_s4 + $0x68] ss:$16 sps:$4 sm:$0xff]   ;;  %v4048_v55 = vld [vmem:[%s4809_s4 + $0x8c] ss:$16 sps:$4 sm:$0xff]  }
  0x2e   : > { %v4055_v56 = vld [vmem:[%s4809_s4 + $0xa0] ss:$16 sps:$4 sm:$0xff]   ;;  %v4061_v57 = vld [vmem:[%s4809_s4 + $0xc4] ss:$16 sps:$4 sm:$0xff]   ;;  %v4066_v58 = vld [vmem:[%s4809_s4 + $0x88] ss:$16 sps:$4 sm:$0xff]  }
  0x2f   : > { %532 = vmatpush1.bf16.msra.mxu0 %v3835_v18  ;;  %573 = vmatpush1.bf16.msra.mxu1 %v3871_v24  ;;  %4832 = vst [vmem:[#allocation6_spill] sm:$0xff] %v4055_v56  ;;  %4833 = vst [vmem:[#allocation7_spill] sm:$0xff] %v4061_v57  ;;  %v4072_v59 = vld [vmem:[%s4809_s4 + $0xac] ss:$16 sps:$4 sm:$0xff]   ;;  %v4079_v60 = vld [vmem:[%s4809_s4 + $0xc0] ss:$16 sps:$4 sm:$0xff]  }
  0x30   : > { %533 = vmatprep.subr.bf16.mxu0 %v3841_v19  ;;  %574 = vmatprep.subr.bf16.mxu1 %v3877_v25  ;;  %4834 = vst [vmem:[#allocation8_spill] sm:$0xff] %v4072_v59  ;;  %v4085_v61 = vld [vmem:[%s4809_s4 + $0xe4] ss:$16 sps:$4 sm:$0xff]   ;;  %v4090_v62 = vld [vmem:[%s4809_s4 + $0xa8] ss:$16 sps:$4 sm:$0xff]   ;;  %s1288_s27 = sadd.s32 2, %s3712_s25 }
  0x31   : > { %4835 = vst [vmem:[#allocation9_spill] sm:$0xff] %v4085_v61  ;;  %v4096_v63 = vld [vmem:[%s4809_s4 + $0xcc] ss:$16 sps:$4 sm:$0xff]   ;;  %v4103_v0 = vld [vmem:[%s4809_s4 + $0xe0] ss:$16 sps:$4 sm:$0xff]   ;;  %s1611_s29 = sadd.s32 2, %s3709_s23 }
  0x32   : > { %s1934_s30 = sadd.s32 1, %s3712_s25 }
  0x33   : > { %534 = vmatpush1.bf16.msra.mxu0 %v3859_v22  ;;  %575 = vmatpush1.bf16.msra.mxu1 %v3895_v28 }
  0x34   : > { %535 = vmatprep.subr.bf16.mxu0 %v3864_v23  ;;  %576 = vmatprep.subr.bf16.mxu1 %v3901_v29 }
  0x37   : > { %536 = vmatpush1.bf16.msra.mxu0 %v3882_v26  ;;  %577 = vmatpush1.bf16.msra.mxu1 %v3921_v33 }
  0x38   : > { %537 = vmatprep.subr.bf16.mxu0 %v3888_v27  ;;  %578 = vmatprep.subr.bf16.mxu1 %v3927_v34 }
  0x3b   : > { %538 = vmatpush1.bf16.msra.mxu0 %v3906_v30  ;;  %579 = vmatpush1.bf16.msra.mxu1 %v3947_v38 }
  0x3c   : > { %847 = vmatprep.subr.bf16.mxu0 %v3914_v32  ;;  %888 = vmatprep.subr.bf16.mxu1 %v3953_v39 }
  0x3e   : > { %556 = vmatmul.mubr.bf16.vlgmr.msra.gmra.mrb[0].mxu0 %v330_v35  ;;  %597 = vmatmul.mubr.bf16.vlgmr.msra.gmra.mrb[0].mxu1 %v330_v35  ;;  %v4105_v35 = vld [vmem:[#allocation4] sm:$0xff] }
  0x3f   : > { %848 = vmatpush1.bf16.msra.mxu0 %v3934_v36  ;;  %879 = vmatprep.mubr.bf16.mxu0 %v4812_v3 }
  0x40   : > { %849 = vmatprep.subr.bf16.mxu0 %v3940_v37  ;;  %889 = vmatpush1.bf16.msra.mxu1 %v3972_v42 }
  0x41   : > { %890 = vmatprep.subr.bf16.mxu1 %v3978_v43  ;;  %920 = vmatprep.mubr.bf16.mxu1 %v4812_v3  ;;  %v4111_v3 = vld [vmem:[%s4809_s4 + $0xc8] ss:$16 sps:$4 sm:$0xff]  }
  0x43   : > { %850 = vmatpush1.bf16.msra.mxu0 %v3958_v40 }
  0x44   : > { %851 = vmatprep.subr.bf16.mxu0 %v3964_v41  ;;  %891 = vmatpush1.bf16.msra.mxu1 %v3996_v46 }
  0x45   : > { %892 = vmatprep.subr.bf16.mxu1 %v4007_v48 }
  0x47   : > { %852 = vmatpush1.bf16.msra.mxu0 %v3984_v44 }
  0x48   : > { %853 = vmatprep.subr.bf16.mxu0 %v3990_v45  ;;  %893 = vmatpush1.bf16.msra.mxu1 %v4019_v50 }
  0x49   : > { %894 = vmatprep.subr.bf16.mxu1 %v4024_v51 }
  0x4b   : > { %854 = vmatpush1.bf16.msra.mxu0 %v4001_v47 }
  0x4c   : > { %855 = vmatprep.subr.bf16.mxu0 %v4013_v49  ;;  %895 = vmatpush1.bf16.msra.mxu1 %v4042_v54 }
  0x4d   : > { %896 = vmatprep.subr.bf16.mxu1 %v4048_v55 }
  0x4f   : > { %856 = vmatpush1.bf16.msra.mxu0 %v4031_v52 }
  0x50   : > { %857 = vmatprep.subr.bf16.mxu0 %v4037_v53  ;;  %897 = vmatpush1.bf16.msra.mxu1 %v4066_v58 }
  0x51   : > { %898 = vmatprep.subr.bf16.mxu1 %v4072_v59  ;;  %v4127_v59 = vld [vmem:[%s4809_s4 + $0xe8] ss:$16 sps:$4 sm:$0xff]  }
  0x53   : > { %858 = vmatpush1.bf16.msra.mxu0 %v4055_v56  ;;  %v654_v56 = vpack.c.bf16 %v4105_v35, %v4105_v35 }
  0x54   : > { %859 = vmatprep.subr.bf16.mxu0 %v4061_v57  ;;  %v4117_v57 = vld [vmem:[%s4809_s4 + $0xec] ss:$16 sps:$4 sm:$0xff]   ;;  %899 = vmatpush1.bf16.msra.mxu1 %v4090_v62 }
  0x55   : > { %900 = vmatprep.subr.bf16.mxu1 %v4096_v63 }
  0x57   : > { %860 = vmatpush1.bf16.msra.mxu0 %v4079_v60 }
  0x58   : > { %861 = vmatprep.subr.bf16.mxu0 %v4085_v61  ;;  %901 = vmatpush1.bf16.msra.mxu1 %v4111_v3  ;;  %v4836_v61 = vmov 0  }
  0x59   : > { %902 = vmatprep.subr.bf16.mxu1 %v4117_v57 }
  0x5b   : > { %862 = vmatpush1.bf16.msra.mxu0 %v4103_v0 }
  0x5c   : > { %1170 = vmatprep.subr.bf16.mxu0 %v3740_v1  ;;  %903 = vmatpush1.bf16.msra.mxu1 %v4127_v59  ;;  %v324_v1 = vld [vmem:[%s3720_s8] sm:$0xff] }
  0x5d   : > { %1211 = vmatprep.subr.bf16.mxu1 %v3770_v7 }
  0x5e   : > { %880 = vmatmul.mubr.bf16.vlgmr.msra.gmra.mrb[4].mxu0 %v654_v56 }
  0x5f   : > { %1171 = vmatpush1.bf16.msra.mxu0 %v3745_v2  ;;  %1202 = vmatprep.mubr.bf16.mxu0 %v4836_v61  ;;  %v326_v2 = vunpack.c.l.bf16 %v324_v1 }
  0x60   : > { %1172 = vmatprep.subr.bf16.mxu0 %v3753_v4  ;;  %921 = vmatmul.mubr.bf16.vlgmr.msra.gmra.mrb[4].mxu1 %v654_v56  ;;  %v327_v4 = vunpack.c.h.bf16 %v324_v1 }
  0x61   : > { %1212 = vmatpush1.bf16.msra.mxu1 %v3775_v8  ;;  %1243 = vmatprep.mubr.bf16.mxu1 %v4836_v61 }
  0x62   : > { %1213 = vmatprep.subr.bf16.mxu1 %v3794_v11 }
  0x63   : > { %1173 = vmatpush1.bf16.msra.mxu0 %v3759_v5 }
  0x64   : > { %1174 = vmatprep.subr.bf16.mxu0 %v3765_v6  ;;  %v325_v6 = vld [vmem:[%s3720_s8 + $0x8] sm:$0xff] }
  0x65   : > { %1214 = vmatpush1.bf16.msra.mxu1 %v3799_v12 }
  0x66   : > { %1215 = vmatprep.subr.bf16.mxu1 %v3816_v15 }
  0x67   : > { %1175 = vmatpush1.bf16.msra.mxu0 %v3781_v9 }
  0x68   : > { %1176 = vmatprep.subr.bf16.mxu0 %v3788_v10 }
  0x69   : > { %1216 = vmatpush1.bf16.msra.mxu1 %v3823_v16 }
  0x6a   : > { %1217 = vmatprep.subr.bf16.mxu1 %v3829_v17 }
  0x6b   : > { %1177 = vmatpush1.bf16.msra.mxu0 %v3806_v13  ;;  %v329_v13 = vunpack.c.h.bf16 %v325_v6 }
  0x6c   : > { %1178 = vmatprep.subr.bf16.mxu0 %v3811_v14 }
  0x6d   : > { %1218 = vmatpush1.bf16.msra.mxu1 %v3847_v20 }
  0x6e   : > { %1219 = vmatprep.subr.bf16.mxu1 %v3853_v21 }
  0x6f   : > { %1179 = vmatpush1.bf16.msra.mxu0 %v3835_v18 }
  0x70   : > { %1180 = vmatprep.subr.bf16.mxu0 %v3841_v19  ;;  %v328_v19 = vunpack.c.l.bf16 %v325_v6 }
  0x71   : > { %1220 = vmatpush1.bf16.msra.mxu1 %v3871_v24 }
  0x72   : > { %1221 = vmatprep.subr.bf16.mxu1 %v3877_v25 }
  0x73   : > { %1181 = vmatpush1.bf16.msra.mxu0 %v3859_v22 }
  0x74   : > { %1182 = vmatprep.subr.bf16.mxu0 %v3864_v23 }
  0x75   : > { %1222 = vmatpush1.bf16.msra.mxu1 %v3895_v28 }
  0x76   : > { %1223 = vmatprep.subr.bf16.mxu1 %v3901_v29  ;;  %v3058_v29 = vld [vmem:[%s3725_s12 + $0x30] sm:$0xff] }
  0x77   : > { %1183 = vmatpush1.bf16.msra.mxu0 %v3882_v26  ;;  %v650_v1 = vunpack.c.l.bf16 %v3058_v29 }
  0x78   : > { %1184 = vmatprep.subr.bf16.mxu0 %v3888_v27 }
  0x79   : > { %1224 = vmatpush1.bf16.msra.mxu1 %v3921_v33  ;;  %v4175_v33 = vld [vmem:[%s4805_s0] sm:$0xff] }
  0x7a   : > { %1225 = vmatprep.subr.bf16.mxu1 %v3927_v34  ;;  %v320_v34 = vstv %s3709_s23 }
  0x7b   : > { %1185 = vmatpush1.bf16.msra.mxu0 %v3906_v30  ;;  %v323_v30 = vld [vmem:[#allocation3] sm:$0xff]  ;;  %vm4179_vm0 = vcmp.lt.s32.totalorder %v320_v34, %v4175_v33 }
  0x7c   : > { %1493 = vmatprep.subr.bf16.mxu0 %v3914_v32 }
  0x7d   : > { %1226 = vmatpush1.bf16.msra.mxu1 %v3947_v38 }
  0x7e   : > { %1534 = vmatprep.subr.bf16.mxu1 %v3953_v39 }
 0x111   : > { %v557_v5 = vpop.f32.mrb[0].mxu0  ;;  %v598_v15 = vpop.f32.mrb[0].mxu1 }
 0x112   : > { %v605_v7 = vadd.f32 %v557_v5, %v326_v2  ;;  %v559_v8 = vpop.f32.mrb[1].mxu0  ;;  %v600_v16 = vpop.f32.mrb[1].mxu1  ;;  %v607_v22 = vadd.f32 %v598_v15, %v328_v19  ;;  %v4299_v5 = vld [vmem:[%s4808_s3 + $0x44] ss:$16 sps:$4 sm:$0xff]  }
 0x113   : > { %v606_v9 = vadd.f32 %v559_v8, %v327_v4  ;;  %v561_v10 = vpop.f32.mrb[2].mxu0  ;;  %v608_v17 = vadd.f32 %v600_v16, %v329_v13  ;;  %v602_v18 = vpop.f32.mrb[2].mxu1  ;;  %v651_v4 = vunpack.c.h.bf16 %v3058_v29  ;;  %v3059_v8 = vld [vmem:[%s3725_s12 + $0x38] sm:$0xff] }
 0x114   : > { %v3054_v11 = vmul.f32 -1.442695, %v605_v7  ;;  %v562_v12 = vpop.f32.mrb[3].mxu0  ;;  %v603_v20 = vpop.f32.mrb[3].mxu1  ;;  %v653_v16 = vunpack.c.h.bf16 %v3059_v8 }
 0x115   : > { %v3055_v14 = vmul.f32 -1.442695, %v606_v9  ;;  %v3056_v21 = vmul.f32 -1.442695, %v608_v17 }
 0x116   : > { %3527 = vpow2.f32 %v3054_v11 }
 0x117   : > { %3529 = vpow2.f32 %v3055_v14 }
 0x118   : > { %3531 = vpow2.f32 %v3056_v21 }
 0x119   : > { %3533 = vtanh.f32 %v607_v22  ;;  %v652_v22 = vunpack.c.l.bf16 %v3059_v8  ;;  %v4314_v8 = vld [vmem:[%s4808_s3 + $0x48] ss:$16 sps:$4 sm:$0xff]  }
 0x120   : > { %v3528_v23 = vpop.eup %3527 }
 0x121   : > { %v3530_v24 = vpop.eup %3529  ;;  %v612_v25 = vadd.f32 1.0, %v3528_v23 }
 0x122   : > { %v618_v26 = vadd.f32 1.0, %v3530_v24  ;;  %v3532_v27 = vpop.eup %3531 }
 0x123   : > { %3535 = vrcp.f32 %v612_v25  ;;  %v3534_v28 = vpop.eup %3533  ;;  %v625_v38 = vadd.f32 1.0, %v3532_v27 }
 0x124   : > { %3537 = vrcp.f32 %v618_v26 }
 0x125   : > { %3539 = vrcp.f32 %v625_v38 }
 0x12d   : > { %v3536_v32 = vpop.eup %3535 }
 0x12e   : > { %v3538_v39 = vpop.eup %3537  ;;  %v629_v56 = vmul.f32 %v3536_v32, %v3534_v28 }
 0x12f   : > { %v628_v2 = vmul.f32 %v3538_v39, %v323_v30  ;;  %v3540_v24 = vpop.eup %3539 }
 0x131   : > { %v630_v6 = vadd.f32 %v629_v56, %v628_v2  ;;  %v881_v7 = vpop.f32.mrb[4].mxu0 }
 0x132   : > { %v929_v9 = vadd.f32 %v881_v7, %v650_v1  ;;  %v883_v10 = vpop.f32.mrb[5].mxu0  ;;  %v4309_v7 = vld [vmem:[%s4808_s3 + $0x40] ss:$16 sps:$4 sm:$0xff]  }
 0x133   : > { %3541 = vtanh.f32 %v630_v6  ;;  %v4186_v11 = vsel %vm4179_vm0, %v630_v6, %v323_v30  ;;  %v930_v12 = vadd.f32 %v883_v10, %v651_v4  ;;  %v885_v13 = vpop.f32.mrb[6].mxu0  ;;  %v922_v18 = vpop.f32.mrb[4].mxu1  ;;  %v4290_v4 = vld [vmem:[%s4808_s3 + $0x28] ss:$16 sps:$4 sm:$0xff]   ;;  %v4304_v6 = vld [vmem:[%s4808_s3 + $0x4c] ss:$16 sps:$4 sm:$0xff]  }
 0x134   : > { %v3092_v14 = vmul.f32 -1.442695, %v929_v9  ;;  %v886_v15 = vpop.f32.mrb[7].mxu0  ;;  %v924_v19 = vpop.f32.mrb[5].mxu1  ;;  %v931_v27 = vadd.f32 %v922_v18, %v652_v22  ;;  %v4323_v9 = vld [vmem:[%s4808_s3 + $0x64] ss:$16 sps:$4 sm:$0xff]  }
 0x135   : > { %v3093_v17 = vmul.f32 -1.442695, %v930_v12  ;;  %v932_v20 = vadd.f32 %v924_v19, %v653_v16  ;;  %v926_v21 = vpop.f32.mrb[6].mxu1  ;;  %v4328_v10 = vld [vmem:[%s4808_s3 + $0x6c] ss:$16 sps:$4 sm:$0xff]  }
 0x136   : > { %3543 = vpow2.f32 %v3092_v14  ;;  %v927_v23 = vpop.f32.mrb[7].mxu1  ;;  %v4333_v12 = vld [vmem:[%s4808_s3 + $0x60] ss:$16 sps:$4 sm:$0xff]   ;;  %v4338_v13 = vld [vmem:[%s4808_s3 + $0x68] ss:$16 sps:$4 sm:$0xff]  }
 0x137   : > { %3545 = vpow2.f32 %v3093_v17  ;;  %v3094_v25 = vmul.f32 -1.442695, %v932_v20  ;;  %v4347_v14 = vld [vmem:[%s4808_s3 + $0x84] ss:$16 sps:$4 sm:$0xff]   ;;  %v4352_v15 = vld [vmem:[%s4808_s3 + $0x8c] ss:$16 sps:$4 sm:$0xff]  }
 0x138   : > { %v4357_v16 = vld [vmem:[%s4808_s3 + $0x80] ss:$16 sps:$4 sm:$0xff]   ;;  %v4362_v17 = vld [vmem:[%s4808_s3 + $0x88] ss:$16 sps:$4 sm:$0xff]   ;;  %v4371_v18 = vld [vmem:[%s4808_s3 + $0xa4] ss:$16 sps:$4 sm:$0xff]  }
 0x139   : > { %3547 = vpow2.f32 %v3094_v25  ;;  %v4376_v19 = vld [vmem:[%s4808_s3 + $0xac] ss:$16 sps:$4 sm:$0xff]   ;;  %v4381_v20 = vld [vmem:[%s4808_s3 + $0xa0] ss:$16 sps:$4 sm:$0xff]   ;;  %v4386_v21 = vld [vmem:[%s4808_s3 + $0xa8] ss:$16 sps:$4 sm:$0xff]  }
 0x13a   : > { %3549 = vtanh.f32 %v931_v27  ;;  %v4395_v22 = vld [vmem:[%s4808_s3 + $0xc4] ss:$16 sps:$4 sm:$0xff]   ;;  %v4400_v23 = vld [vmem:[%s4808_s3 + $0xcc] ss:$16 sps:$4 sm:$0xff]   ;;  %v4410_v25 = vld [vmem:[%s4808_s3 + $0xc8] ss:$16 sps:$4 sm:$0xff]  }
 0x13b   : > { %v4424_v27 = vld [vmem:[%s4808_s3 + $0xec] ss:$16 sps:$4 sm:$0xff]  }
 0x13d   : > { %v3542_v26 = vpop.eup %3541 }
 0x13e   : > { %v632_v28 = vmul.f32 %v3542_v26, %v3540_v24  ;;  %v4405_v24 = vld [vmem:[%s4808_s3 + $0xc0] ss:$16 sps:$4 sm:$0xff]   ;;  %v4419_v26 = vld [vmem:[%s4808_s3 + $0xe4] ss:$16 sps:$4 sm:$0xff]  }
 0x140   : > { %v3544_v29 = vpop.eup %3543  ;;  %v4191_v30 = vsel %vm4179_vm0, %v632_v28, %v3908_v31  ;;  %v637_v32 = vsel %vm4179_vm0, %v632_v28, 0.0  ;;  %v4429_v28 = vld [vmem:[%s4808_s3 + $0xe0] ss:$16 sps:$4 sm:$0xff]  }
 0x141   : > { %v3546_v34 = vpop.eup %3545  ;;  %v638_v38 = vpack.c.bf16 %v637_v32, %v637_v32  ;;  %v936_v39 = vadd.f32 1.0, %v3544_v29  ;;  %v977_v56 = vpack.c.bf16 %v4191_v30, %v4191_v30  ;;  %v4434_v29 = vld [vmem:[%s4808_s3 + $0xe8] ss:$16 sps:$4 sm:$0xff]   ;;  %v4443_v32 = vld [vmem:[%s4809_s4 + $0x4] ss:$16 sps:$4 sm:$0xff]  }
 0x142   : > { %v942_v1 = vadd.f32 1.0, %v3546_v34  ;;  %v4448_v34 = vld [vmem:[%s4809_s4 + $0xc] ss:$16 sps:$4 sm:$0xff]  }
 0x143   : > { %639 = vst [vmem:[%s3730_s15] sm:$0xf] %v638_v38  ;;  %3551 = vrcp.f32 %v936_v39  ;;  %1203 = vmatmul.mubr.bf16.vlgmr.msra.gmra.mrb[8].mxu0 %v977_v56  ;;  %1244 = vmatmul.mubr.bf16.vlgmr.msra.gmra.mrb[8].mxu1 %v977_v56  ;;  %v3548_v31 = vpop.eup %3547  ;;  %v3096_v38 = vld [vmem:[%s3720_s8 + $0x10] sm:$0xff] }
 0x144   : > { %3553 = vrcp.f32 %v942_v1  ;;  %1494 = vmatpush1.bf16.msra.mxu0 %v3934_v36  ;;  %1535 = vmatpush1.bf16.msra.mxu1 %v3972_v42  ;;  %v3550_v36 = vpop.eup %3549  ;;  %v646_v42 = vld [vmem:[#allocation5] sm:$0xff]  ;;  %v949_v2 = vadd.f32 1.0, %v3548_v31  ;;  %v973_v39 = vunpack.c.l.bf16 %v3096_v38  ;;  %v974_v56 = vunpack.c.h.bf16 %v3096_v38 }
 0x145   : > { %1495 = vmatprep.subr.bf16.mxu0 %v3940_v37  ;;  %1536 = vmatprep.subr.bf16.mxu1 %v3978_v43  ;;  %v643_v43 = vstv %s642_s11 }
 0x146   : > { %1525 = vmatprep.mubr.bf16.mxu0 %v4836_v61  ;;  %1566 = vmatprep.mubr.bf16.mxu1 %v4836_v61  ;;  %vm644_vm1 = vcmp.lt.s32.totalorder %v643_v43, %v4175_v33  ;;  %3555 = vrcp.f32 %v949_v2 }
 0x148   : > { %1496 = vmatpush1.bf16.msra.mxu0 %v3958_v40  ;;  %1537 = vmatpush1.bf16.msra.mxu1 %v3996_v46 }
 0x149   : > { %1497 = vmatprep.subr.bf16.mxu0 %v3964_v41  ;;  %1538 = vmatprep.subr.bf16.mxu1 %v4007_v48 }
 0x14c   : > { %1498 = vmatpush1.bf16.msra.mxu0 %v3984_v44  ;;  %1539 = vmatpush1.bf16.msra.mxu1 %v4019_v50 }
 0x14d   : > { %v3552_v37 = vpop.eup %3551  ;;  %1499 = vmatprep.subr.bf16.mxu0 %v3990_v45  ;;  %1540 = vmatprep.subr.bf16.mxu1 %v4024_v51  ;;  %v4839_v45 = vld [vmem:[#allocation8_spill] sm:$0xff] }
 0x14e   : > { %v3554_v40 = vpop.eup %3553  ;;  %v953_v46 = vmul.f32 %v3552_v37, %v3550_v36 }
 0x14f   : > { %v952_v41 = vmul.f32 %v3554_v40, %v646_v42 }
 0x150   : > { %1500 = vmatpush1.bf16.msra.mxu0 %v4001_v47  ;;  %1541 = vmatpush1.bf16.msra.mxu1 %v4042_v54  ;;  %v4840_v47 = vld [vmem:[#allocation6_spill] sm:$0xff]  ;;  %v3556_v50 = vpop.eup %3555 }
 0x151   : > { %v954_v48 = vadd.f32 %v953_v46, %v952_v41  ;;  %1501 = vmatprep.subr.bf16.mxu0 %v4013_v49  ;;  %1542 = vmatprep.subr.bf16.mxu1 %v4048_v55  ;;  %v4841_v49 = vld [vmem:[#allocation7_spill] sm:$0xff] }
 0x153   : > { %3557 = vtanh.f32 %v954_v48  ;;  %v4220_v44 = vsel %vm644_vm1, %v954_v48, %v646_v42  ;;  %v3097_v42 = vld [vmem:[%s3720_s8 + $0x18] sm:$0xff] }
 0x154   : > { %1502 = vmatpush1.bf16.msra.mxu0 %v4031_v52  ;;  %1543 = vmatpush1.bf16.msra.mxu1 %v4066_v58  ;;  %v4842_v52 = vld [vmem:[#allocation9_spill] sm:$0xff] }
 0x155   : > { %1503 = vmatprep.subr.bf16.mxu0 %v4037_v53  ;;  %1544 = vmatprep.subr.bf16.mxu1 %v4839_v45 }
 0x158   : > { %1504 = vmatpush1.bf16.msra.mxu0 %v4840_v47  ;;  %1545 = vmatpush1.bf16.msra.mxu1 %v4090_v62  ;;  %v4266_v62 = vld [vmem:[%s4808_s3 + $0x8] ss:$16 sps:$4 sm:$0xff]  }
 0x159   : > { %1505 = vmatprep.subr.bf16.mxu0 %v4841_v49  ;;  %1546 = vmatprep.subr.bf16.mxu1 %v4096_v63  ;;  %v4275_v63 = vld [vmem:[%s4808_s3 + $0x24] ss:$16 sps:$4 sm:$0xff]   ;;  %v976_v49 = vunpack.c.h.bf16 %v3097_v42 }
 0x15c   : > { %1506 = vmatpush1.bf16.msra.mxu0 %v4079_v60  ;;  %1547 = vmatpush1.bf16.msra.mxu1 %v4111_v3  ;;  %v4261_v60 = vld [vmem:[%s4808_s3] ss:$16 sps:$4 sm:$0xff]  }
 0x15d   : > { %v3558_v51 = vpop.eup %3557  ;;  %1507 = vmatprep.subr.bf16.mxu0 %v4842_v52  ;;  %1548 = vmatprep.subr.bf16.mxu1 %v4117_v57  ;;  %v4251_v57 = vld [vmem:[%s4808_s3 + $0x4] ss:$16 sps:$4 sm:$0xff]  }
 0x15e   : > { %v956_v53 = vmul.f32 %v3558_v51, %v3556_v50  ;;  %v975_v51 = vunpack.c.l.bf16 %v3097_v42 }
 0x160   : > { %v4237_v54 = vsel %vm644_vm1, %v956_v53, %v4105_v35  ;;  %v961_v55 = vsel %vm644_vm1, %v956_v53, 0.0  ;;  %1508 = vmatpush1.bf16.msra.mxu0 %v4103_v0  ;;  %1549 = vmatpush1.bf16.msra.mxu1 %v4127_v59  ;;  %v4256_v59 = vld [vmem:[%s4808_s3 + $0xc] ss:$16 sps:$4 sm:$0xff]   ;;  %v4285_v35 = vld [vmem:[%s4808_s3 + $0x20] ss:$16 sps:$4 sm:$0xff]  }
 0x161   : > { %v962_v58 = vpack.c.bf16 %v961_v55, %v961_v55  ;;  %v1300_v3 = vpack.c.bf16 %v4237_v54, %v4237_v54  ;;  %1816 = vmatprep.subr.bf16.mxu0 %v4251_v57  ;;  %1857 = vmatprep.subr.bf16.mxu1 %v4256_v59  ;;  %v4280_v0 = vld [vmem:[%s4808_s3 + $0x2c] ss:$16 sps:$4 sm:$0xff]  }
 0x163   : > { %3095 = vst [vmem:[%s3735_s19 + $0xc] sm:$0xf] %v962_v58  ;;  %1526 = vmatmul.mubr.bf16.vlgmr.msra.gmra.mrb[12].mxu0 %v1300_v3  ;;  %1567 = vmatmul.mubr.bf16.vlgmr.msra.gmra.mrb[12].mxu1 %v1300_v3 }
 0x164   : > { %1848 = vmatprep.mubr.bf16.mxu0 %v4836_v61  ;;  %1889 = vmatprep.mubr.bf16.mxu1 %v4836_v61 }
 0x165   : > { %1817 = vmatpush1.bf16.msra.mxu0 %v4261_v60  ;;  %1858 = vmatpush1.bf16.msra.mxu1 %v4266_v62 }
 0x166   : > { %1818 = vmatprep.subr.bf16.mxu0 %v4275_v63  ;;  %1859 = vmatprep.subr.bf16.mxu1 %v4280_v0 }
 0x169   : > { %1819 = vmatpush1.bf16.msra.mxu0 %v4285_v35  ;;  %1860 = vmatpush1.bf16.msra.mxu1 %v4290_v4 }
 0x16a   : > { %1820 = vmatprep.subr.bf16.mxu0 %v4299_v5  ;;  %1861 = vmatprep.subr.bf16.mxu1 %v4304_v6 }
 0x16d   : > { %1821 = vmatpush1.bf16.msra.mxu0 %v4309_v7  ;;  %1862 = vmatpush1.bf16.msra.mxu1 %v4314_v8 }
 0x16e   : > { %1822 = vmatprep.subr.bf16.mxu0 %v4323_v9  ;;  %1863 = vmatprep.subr.bf16.mxu1 %v4328_v10 }
 0x171   : > { %1823 = vmatpush1.bf16.msra.mxu0 %v4333_v12  ;;  %1864 = vmatpush1.bf16.msra.mxu1 %v4338_v13 }
 0x172   : > { %1824 = vmatprep.subr.bf16.mxu0 %v4347_v14  ;;  %1865 = vmatprep.subr.bf16.mxu1 %v4352_v15 }
 0x175   : > { %1825 = vmatpush1.bf16.msra.mxu0 %v4357_v16  ;;  %1866 = vmatpush1.bf16.msra.mxu1 %v4362_v17 }
 0x176   : > { %1826 = vmatprep.subr.bf16.mxu0 %v4371_v18  ;;  %1867 = vmatprep.subr.bf16.mxu1 %v4376_v19 }
 0x179   : > { %1827 = vmatpush1.bf16.msra.mxu0 %v4381_v20  ;;  %1868 = vmatpush1.bf16.msra.mxu1 %v4386_v21 }
 0x17a   : > { %1828 = vmatprep.subr.bf16.mxu0 %v4395_v22  ;;  %1869 = vmatprep.subr.bf16.mxu1 %v4400_v23 }
 0x17d   : > { %1829 = vmatpush1.bf16.msra.mxu0 %v4405_v24  ;;  %1870 = vmatpush1.bf16.msra.mxu1 %v4410_v25 }
 0x17e   : > { %1830 = vmatprep.subr.bf16.mxu0 %v4419_v26  ;;  %1871 = vmatprep.subr.bf16.mxu1 %v4424_v27 }
 0x181   : > { %1831 = vmatpush1.bf16.msra.mxu0 %v4429_v28  ;;  %1872 = vmatpush1.bf16.msra.mxu1 %v4434_v29 }
 0x182   : > { %2139 = vmatprep.subr.bf16.mxu0 %v4443_v32  ;;  %2180 = vmatprep.subr.bf16.mxu1 %v4448_v34 }
 0x216   : > { %v1204_v1 = vpop.f32.mrb[8].mxu0  ;;  %v1245_v31 = vpop.f32.mrb[8].mxu1 }
 0x217   : > { %v1252_v36 = vadd.f32 %v1204_v1, %v973_v39  ;;  %v1206_v37 = vpop.f32.mrb[9].mxu0  ;;  %v1247_v43 = vpop.f32.mrb[9].mxu1  ;;  %v1254_v53 = vadd.f32 %v1245_v31, %v975_v51 }
 0x218   : > { %v1253_v2 = vadd.f32 %v1206_v37, %v974_v56  ;;  %v1208_v40 = vpop.f32.mrb[10].mxu0  ;;  %v1249_v46 = vpop.f32.mrb[10].mxu1  ;;  %v1255_v50 = vadd.f32 %v1247_v43, %v976_v49  ;;  %v3134_v56 = vld [vmem:[%s3725_s12 + $0x20] sm:$0xff]  ;;  %v966_v37 = vstv %s965_s13  ;;  %v3135_v49 = vld [vmem:[%s3725_s12 + $0x28] sm:$0xff] }
 0x219   : > { %v3130_v41 = vmul.f32 -1.442695, %v1252_v36  ;;  %v1209_v48 = vpop.f32.mrb[11].mxu0  ;;  %v1250_v45 = vpop.f32.mrb[11].mxu1  ;;  %v1296_v40 = vunpack.c.l.bf16 %v3134_v56  ;;  %v1297_v46 = vunpack.c.h.bf16 %v3134_v56  ;;  %vm967_vm2 = vcmp.lt.s32.totalorder %v966_v37, %v4175_v33  ;;  %v4486_v37 = vld [vmem:[%s4809_s4 + $0x24] ss:$16 sps:$4 sm:$0xff]  }
 0x21a   : > { %v3131_v47 = vmul.f32 -1.442695, %v1253_v2  ;;  %v3132_v52 = vmul.f32 -1.442695, %v1255_v50 }
 0x21b   : > { %3559 = vpow2.f32 %v3130_v41 }
 0x21c   : > { %3561 = vpow2.f32 %v3131_v47 }
 0x21d   : > { %3563 = vpow2.f32 %v3132_v52 }
 0x21e   : > { %3565 = vtanh.f32 %v1254_v53 }
 0x225   : > { %v3560_v55 = vpop.eup %3559 }
 0x226   : > { %v3562_v58 = vpop.eup %3561  ;;  %v1259_v3 = vadd.f32 1.0, %v3560_v55 }
 0x227   : > { %v1265_v38 = vadd.f32 1.0, %v3562_v58  ;;  %v3564_v39 = vpop.eup %3563 }
 0x228   : > { %3567 = vrcp.f32 %v1259_v3  ;;  %v3566_v1 = vpop.eup %3565  ;;  %v1272_v42 = vadd.f32 1.0, %v3564_v39 }
 0x229   : > { %3569 = vrcp.f32 %v1265_v38 }
 0x22a   : > { %3571 = vrcp.f32 %v1272_v42 }
 0x232   : > { %v3568_v36 = vpop.eup %3567 }
 0x233   : > { %v3570_v2 = vpop.eup %3569  ;;  %v1276_v43 = vmul.f32 %v3568_v36, %v3566_v1  ;;  %v1299_v1 = vunpack.c.h.bf16 %v3135_v49 }
 0x234   : > { %v1275_v31 = vmul.f32 %v3570_v2, %v4186_v11  ;;  %v1298_v2 = vunpack.c.l.bf16 %v3135_v49  ;;  %v4479_v49 = vld [vmem:[%s4809_s4 + $0x8] ss:$16 sps:$4 sm:$0xff]  }
 0x236   : > { %v1277_v41 = vadd.f32 %v1276_v43, %v1275_v31  ;;  %v1527_v48 = vpop.f32.mrb[12].mxu0  ;;  %v1568_v45 = vpop.f32.mrb[12].mxu1 }
 0x237   : > { %v1575_v47 = vadd.f32 %v1527_v48, %v1296_v40  ;;  %v1529_v50 = vpop.f32.mrb[13].mxu0  ;;  %v1570_v51 = vpop.f32.mrb[13].mxu1  ;;  %v1577_v48 = vadd.f32 %v1568_v45, %v1298_v2  ;;  %v4542_v2 = vld [vmem:[%s4809_s4 + $0x6c] ss:$16 sps:$4 sm:$0xff]  }
 0x238   : > { %3573 = vtanh.f32 %v1277_v41  ;;  %v4462_v52 = vsel %vm967_vm2, %v1277_v41, %v4186_v11  ;;  %v1576_v53 = vadd.f32 %v1529_v50, %v1297_v46  ;;  %v1531_v55 = vpop.f32.mrb[14].mxu0  ;;  %v1572_v58 = vpop.f32.mrb[14].mxu1  ;;  %v1578_v36 = vadd.f32 %v1570_v51, %v1299_v1  ;;  %v4530_v1 = vld [vmem:[%s4809_s4 + $0x48] ss:$16 sps:$4 sm:$0xff]   ;;  %4844 = vst [vmem:[#allocation6_spill] sm:$0xff] %v4542_v2 }
 0x239   : > { %v3168_v3 = vmul.f32 -1.442695, %v1575_v47  ;;  %v1532_v38 = vpop.f32.mrb[15].mxu0  ;;  %v1573_v39 = vpop.f32.mrb[15].mxu1  ;;  %v4474_v47 = vld [vmem:[%s4809_s4] ss:$16 sps:$4 sm:$0xff]  }
 0x23a   : > { %v3169_v56 = vmul.f32 -1.442695, %v1576_v53  ;;  %v3572_v43 = vpop.eup %3571  ;;  %v3170_v40 = vmul.f32 -1.442695, %v1578_v36  ;;  %v4491_v53 = vld [vmem:[%s4809_s4 + $0x2c] ss:$16 sps:$4 sm:$0xff]  }
 0x23b   : > { %3575 = vpow2.f32 %v3168_v3  ;;  %v4499_v58 = vld [vmem:[%s4809_s4 + $0x20] ss:$16 sps:$4 sm:$0xff]   ;;  %v4504_v3 = vld [vmem:[%s4809_s4 + $0x28] ss:$16 sps:$4 sm:$0xff]   ;;  %v4511_v38 = vld [vmem:[%s4809_s4 + $0x44] ss:$16 sps:$4 sm:$0xff]  }
 0x23c   : > { %3577 = vpow2.f32 %v3169_v56  ;;  %v4516_v39 = vld [vmem:[%s4809_s4 + $0x4c] ss:$16 sps:$4 sm:$0xff]   ;;  %v4525_v56 = vld [vmem:[%s4809_s4 + $0x40] ss:$16 sps:$4 sm:$0xff]   ;;  %v4537_v36 = vld [vmem:[%s4809_s4 + $0x64] ss:$16 sps:$4 sm:$0xff]  }
 0x23d   : > { %3579 = vpow2.f32 %v3170_v40  ;;  %4843 = vst [vmem:[#allocation8_spill] sm:$0xff] %v4537_v36  ;;  %v4550_v40 = vld [vmem:[%s4809_s4 + $0x60] ss:$16 sps:$4 sm:$0xff]  }
 0x23e   : > { %3581 = vtanh.f32 %v1577_v48 }
 0x242   : > { %v3574_v42 = vpop.eup %3573 }
 0x243   : > { %v1279_v31 = vmul.f32 %v3574_v42, %v3572_v43 }
 0x245   : > { %v3576_v11 = vpop.eup %3575  ;;  %v4467_v46 = vsel %vm967_vm2, %v1279_v31, %v4191_v30  ;;  %v1284_v41 = vsel %vm967_vm2, %v1279_v31, 0.0  ;;  %v4555_v31 = vld [vmem:[%s4809_s4 + $0x68] ss:$16 sps:$4 sm:$0xff]  }
 0x246   : > { %v3578_v45 = vpop.eup %3577  ;;  %v1285_v50 = vpack.c.bf16 %v1284_v41, %v1284_v41  ;;  %v1582_v51 = vadd.f32 1.0, %v3576_v11  ;;  %v1623_v30 = vpack.c.bf16 %v4467_v46, %v4467_v46  ;;  %v1289_v11 = vstv %s1288_s27  ;;  %v4562_v41 = vld [vmem:[%s4809_s4 + $0x84] ss:$16 sps:$4 sm:$0xff]  }
 0x247   : > { %v1588_v55 = vadd.f32 1.0, %v3578_v45  ;;  %v3580_v43 = vpop.eup %3579  ;;  %4845 = vst [vmem:[#allocation7_spill] sm:$0xff] %v4562_v41  ;;  %v4567_v45 = vld [vmem:[%s4809_s4 + $0x8c] ss:$16 sps:$4 sm:$0xff]   ;;  %vm1290_vm3 = vcmp.lt.s32.totalorder %v1289_v11, %v4175_v33 }
 0x248   : > { %3133 = vst [vmem:[%s3730_s15 + $0x4] sm:$0xf] %v1285_v50  ;;  %3583 = vrcp.f32 %v1582_v51  ;;  %1849 = vmatmul.mubr.bf16.vlgmr.msra.gmra.mrb[16].mxu0 %v1623_v30  ;;  %1890 = vmatmul.mubr.bf16.vlgmr.msra.gmra.mrb[16].mxu1 %v1623_v30  ;;  %v3582_v42 = vpop.eup %3581  ;;  %4846 = vst [vmem:[#allocation9_spill] sm:$0xff] %v4567_v45  ;;  %v1595_v30 = vadd.f32 1.0, %v3580_v43  ;;  %v4588_v43 = vld [vmem:[%s4809_s4 + $0xa4] ss:$16 sps:$4 sm:$0xff]  }
 0x249   : > { %3585 = vrcp.f32 %v1588_v55  ;;  %2140 = vmatpush1.bf16.msra.mxu0 %v4474_v47  ;;  %2181 = vmatpush1.bf16.msra.mxu1 %v4479_v49  ;;  %4849 = vst [vmem:[#allocation12_spill] sm:$0xff] %v4588_v43 }
 0x24a   : > { %2141 = vmatprep.subr.bf16.mxu0 %v4486_v37  ;;  %2182 = vmatprep.subr.bf16.mxu1 %v4491_v53  ;;  %3587 = vrcp.f32 %v1595_v30  ;;  %v4622_v30 = vld [vmem:[%s4809_s4 + $0xcc] ss:$16 sps:$4 sm:$0xff]  }
 0x24b   : > { %2171 = vmatprep.mubr.bf16.mxu0 %v4836_v61  ;;  %2212 = vmatprep.mubr.bf16.mxu1 %v4836_v61  ;;  %4854 = vst [vmem:[#allocation17_spill] sm:$0xff] %v4622_v30 }
 0x24d   : > { %2142 = vmatpush1.bf16.msra.mxu0 %v4499_v58  ;;  %2183 = vmatpush1.bf16.msra.mxu1 %v4504_v3 }
 0x24e   : > { %2143 = vmatprep.subr.bf16.mxu0 %v4511_v38  ;;  %2184 = vmatprep.subr.bf16.mxu1 %v4516_v39 }
 0x251   : > { %2144 = vmatpush1.bf16.msra.mxu0 %v4525_v56  ;;  %2185 = vmatpush1.bf16.msra.mxu1 %v4530_v1 }
 0x252   : > { %v3584_v48 = vpop.eup %3583  ;;  %2145 = vmatprep.subr.bf16.mxu0 %v4537_v36  ;;  %2186 = vmatprep.subr.bf16.mxu1 %v4542_v2  ;;  %v4576_v2 = vld [vmem:[%s4809_s4 + $0x80] ss:$16 sps:$4 sm:$0xff]   ;;  %v4581_v36 = vld [vmem:[%s4809_s4 + $0x88] ss:$16 sps:$4 sm:$0xff]  }
 0x253   : > { %v3586_v50 = vpop.eup %3585  ;;  %v1599_v51 = vmul.f32 %v3584_v48, %v3582_v42  ;;  %4847 = vst [vmem:[#allocation10_spill] sm:$0xff] %v4576_v2  ;;  %4848 = vst [vmem:[#allocation11_spill] sm:$0xff] %v4581_v36  ;;  %v4593_v48 = vld [vmem:[%s4809_s4 + $0xac] ss:$16 sps:$4 sm:$0xff]  }
 0x254   : > { %v1598_v55 = vmul.f32 %v3586_v50, %v4220_v44  ;;  %4850 = vst [vmem:[#allocation13_spill] sm:$0xff] %v4593_v48 }
 0x255   : > { %2146 = vmatpush1.bf16.msra.mxu0 %v4550_v40  ;;  %2187 = vmatpush1.bf16.msra.mxu1 %v4555_v31 }
 0x256   : > { %v1600_v42 = vadd.f32 %v1599_v51, %v1598_v55  ;;  %2147 = vmatprep.subr.bf16.mxu0 %v4562_v41  ;;  %2188 = vmatprep.subr.bf16.mxu1 %v4567_v45  ;;  %v4605_v51 = vld [vmem:[%s4809_s4 + $0xa0] ss:$16 sps:$4 sm:$0xff]   ;;  %v4610_v55 = vld [vmem:[%s4809_s4 + $0xa8] ss:$16 sps:$4 sm:$0xff]  }
 0x257   : > { %4851 = vst [vmem:[#allocation14_spill] sm:$0xff] %v4605_v51  ;;  %4852 = vst [vmem:[#allocation15_spill] sm:$0xff] %v4610_v55 }
 0x258   : > { %3589 = vtanh.f32 %v1600_v42  ;;  %v4598_v50 = vsel %vm1290_vm3, %v1600_v42, %v4220_v44  ;;  %v4617_v44 = vld [vmem:[%s4809_s4 + $0xc4] ss:$16 sps:$4 sm:$0xff]   ;;  %v4629_v42 = vld [vmem:[%s4809_s4 + $0xc0] ss:$16 sps:$4 sm:$0xff]  }
 0x259   : > { %2148 = vmatpush1.bf16.msra.mxu0 %v4576_v2  ;;  %2189 = vmatpush1.bf16.msra.mxu1 %v4581_v36  ;;  %4853 = vst [vmem:[#allocation16_spill] sm:$0xff] %v4617_v44  ;;  %4855 = vst [vmem:[#allocation18_spill] sm:$0xff] %v4629_v42 }
 0x25a   : > { %2149 = vmatprep.subr.bf16.mxu0 %v4588_v43  ;;  %2190 = vmatprep.subr.bf16.mxu1 %v4593_v48  ;;  %v4634_v48 = vld [vmem:[%s4809_s4 + $0xc8] ss:$16 sps:$4 sm:$0xff]   ;;  %v3588_v43 = vpop.eup %3587 }
 0x25b   : > { %4856 = vst [vmem:[#allocation19_spill] sm:$0xff] %v4634_v48 }
 0x25d   : > { %2150 = vmatpush1.bf16.msra.mxu0 %v4605_v51  ;;  %2191 = vmatpush1.bf16.msra.mxu1 %v4610_v55  ;;  %v4641_v51 = vld [vmem:[%s4809_s4 + $0xe4] ss:$16 sps:$4 sm:$0xff]   ;;  %v4646_v55 = vld [vmem:[%s4809_s4 + $0xec] ss:$16 sps:$4 sm:$0xff]  }
 0x25e   : > { %2151 = vmatprep.subr.bf16.mxu0 %v4617_v44  ;;  %2192 = vmatprep.subr.bf16.mxu1 %v4622_v30  ;;  %v4653_v30 = vld [vmem:[%s4809_s4 + $0xe0] ss:$16 sps:$4 sm:$0xff]   ;;  %v4658_v44 = vld [vmem:[%s4809_s4 + $0xe8] ss:$16 sps:$4 sm:$0xff]  }
 0x261   : > { %2152 = vmatpush1.bf16.msra.mxu0 %v4629_v42  ;;  %2193 = vmatpush1.bf16.msra.mxu1 %v4634_v48 }
 0x262   : > { %v3590_v36 = vpop.eup %3589  ;;  %2153 = vmatprep.subr.bf16.mxu0 %v4641_v51  ;;  %2194 = vmatprep.subr.bf16.mxu1 %v4646_v55 }
 0x263   : > { %v1602_v2 = vmul.f32 %v3590_v36, %v3588_v43  ;;  %v3211_v43 = vld [vmem:[%s3725_s12 + $0x18] sm:$0xff] }
 0x265   : > { %v4665_v48 = vsel %vm1290_vm3, %v1602_v2, %v4237_v54  ;;  %v1607_v42 = vsel %vm1290_vm3, %v1602_v2, 0.0  ;;  %2154 = vmatpush1.bf16.msra.mxu0 %v4653_v30  ;;  %2195 = vmatpush1.bf16.msra.mxu1 %v4658_v44  ;;  %v3172_v54 = vld [vmem:[%s3720_s8 + $0x20] sm:$0xff] }
 0x266   : > { %v1608_v45 = vpack.c.bf16 %v1607_v42, %v1607_v42  ;;  %v1946_v41 = vpack.c.bf16 %v4665_v48, %v4665_v48  ;;  %2462 = vmatprep.subr.bf16.mxu0 %v4251_v57  ;;  %2503 = vmatprep.subr.bf16.mxu1 %v4256_v59  ;;  %v1619_v57 = vunpack.c.l.bf16 %v3172_v54  ;;  %v1620_v59 = vunpack.c.h.bf16 %v3172_v54 }
 0x268   : > { %3171 = vst [vmem:[%s3735_s19 + $0x8] sm:$0xf] %v1608_v45  ;;  %2172 = vmatmul.mubr.bf16.vlgmr.msra.gmra.mrb[20].mxu0 %v1946_v41  ;;  %2213 = vmatmul.mubr.bf16.vlgmr.msra.gmra.mrb[20].mxu1 %v1946_v41 }
 0x269   : > { %2463 = vmatpush1.bf16.msra.mxu0 %v4261_v60  ;;  %2504 = vmatpush1.bf16.msra.mxu1 %v4266_v62 }
 0x26a   : > { %2464 = vmatprep.subr.bf16.mxu0 %v4275_v63  ;;  %2505 = vmatprep.subr.bf16.mxu1 %v4280_v0  ;;  %v3173_v0 = vld [vmem:[%s3720_s8 + $0x28] sm:$0xff] }
 0x26b   : > { %2494 = vmatprep.mubr.bf16.mxu0 %v4836_v61  ;;  %2535 = vmatprep.mubr.bf16.mxu1 %v4836_v61 }
 0x26d   : > { %2465 = vmatpush1.bf16.msra.mxu0 %v4285_v35  ;;  %2506 = vmatpush1.bf16.msra.mxu1 %v4290_v4 }
 0x26e   : > { %2466 = vmatprep.subr.bf16.mxu0 %v4299_v5  ;;  %2507 = vmatprep.subr.bf16.mxu1 %v4304_v6 }
 0x271   : > { %2467 = vmatpush1.bf16.msra.mxu0 %v4309_v7  ;;  %2508 = vmatpush1.bf16.msra.mxu1 %v4314_v8 }
 0x272   : > { %2468 = vmatprep.subr.bf16.mxu0 %v4323_v9  ;;  %2509 = vmatprep.subr.bf16.mxu1 %v4328_v10 }
 0x275   : > { %2469 = vmatpush1.bf16.msra.mxu0 %v4333_v12  ;;  %2510 = vmatpush1.bf16.msra.mxu1 %v4338_v13  ;;  %v1622_v13 = vunpack.c.h.bf16 %v3173_v0 }
 0x276   : > { %2470 = vmatprep.subr.bf16.mxu0 %v4347_v14  ;;  %2511 = vmatprep.subr.bf16.mxu1 %v4352_v15  ;;  %v1621_v15 = vunpack.c.l.bf16 %v3173_v0 }
 0x279   : > { %2471 = vmatpush1.bf16.msra.mxu0 %v4357_v16  ;;  %2512 = vmatpush1.bf16.msra.mxu1 %v4362_v17 }
 0x27a   : > { %2472 = vmatprep.subr.bf16.mxu0 %v4371_v18  ;;  %2513 = vmatprep.subr.bf16.mxu1 %v4376_v19 }
 0x27d   : > { %2473 = vmatpush1.bf16.msra.mxu0 %v4381_v20  ;;  %2514 = vmatpush1.bf16.msra.mxu1 %v4386_v21 }
 0x27e   : > { %2474 = vmatprep.subr.bf16.mxu0 %v4395_v22  ;;  %2515 = vmatprep.subr.bf16.mxu1 %v4400_v23  ;;  %v3210_v23 = vld [vmem:[%s3725_s12 + $0x10] sm:$0xff] }
 0x27f   : > { %v1943_v36 = vunpack.c.h.bf16 %v3210_v23 }
 0x281   : > { %2475 = vmatpush1.bf16.msra.mxu0 %v4405_v24  ;;  %2516 = vmatpush1.bf16.msra.mxu1 %v4410_v25 }
 0x282   : > { %2476 = vmatprep.subr.bf16.mxu0 %v4419_v26  ;;  %2517 = vmatprep.subr.bf16.mxu1 %v4424_v27  ;;  %v1612_v26 = vstv %s1611_s29 }
 0x283   : > { %vm1613_vm4 = vcmp.lt.s32.totalorder %v1612_v26, %v4175_v33  ;;  %v4866_v26 = vld [vmem:[#allocation15_spill] sm:$0xff] }
 0x285   : > { %2477 = vmatpush1.bf16.msra.mxu0 %v4429_v28  ;;  %2518 = vmatpush1.bf16.msra.mxu1 %v4434_v29 }
 0x286   : > { %2783 = vmatprep.subr.bf16.mxu0 %v4443_v32  ;;  %2824 = vmatprep.subr.bf16.mxu1 %v4448_v34  ;;  %v1942_v32 = vunpack.c.l.bf16 %v3210_v23  ;;  %v4861_v23 = vld [vmem:[#allocation10_spill] sm:$0xff] }
 0x31b   : > { %v1850_v60 = vpop.f32.mrb[16].mxu0  ;;  %v1891_v62 = vpop.f32.mrb[16].mxu1 }
 0x31c   : > { %v1898_v63 = vadd.f32 %v1850_v60, %v1619_v57  ;;  %v1852_v35 = vpop.f32.mrb[17].mxu0  ;;  %v1893_v4 = vpop.f32.mrb[17].mxu1  ;;  %v1900_v17 = vadd.f32 %v1891_v62, %v1621_v15 }
 0x31d   : > { %v1899_v5 = vadd.f32 %v1852_v35, %v1620_v59  ;;  %v1854_v6 = vpop.f32.mrb[18].mxu0  ;;  %v1895_v7 = vpop.f32.mrb[18].mxu1  ;;  %v1901_v14 = vadd.f32 %v1893_v4, %v1622_v13 }
 0x31e   : > { %v3206_v8 = vmul.f32 -1.442695, %v1898_v63  ;;  %v1855_v9 = vpop.f32.mrb[19].mxu0  ;;  %v1896_v10 = vpop.f32.mrb[19].mxu1  ;;  %v1944_v7 = vunpack.c.l.bf16 %v3211_v43 }
 0x31f   : > { %v3207_v12 = vmul.f32 -1.442695, %v1899_v5  ;;  %v3208_v16 = vmul.f32 -1.442695, %v1901_v14  ;;  %v1945_v5 = vunpack.c.h.bf16 %v3211_v43 }
 0x320   : > { %3591 = vpow2.f32 %v3206_v8 }
 0x321   : > { %3593 = vpow2.f32 %v3207_v12 }
 0x322   : > { %3595 = vpow2.f32 %v3208_v16 }
 0x323   : > { %3597 = vtanh.f32 %v1900_v17 }
 0x32a   : > { %v3592_v18 = vpop.eup %3591 }
 0x32b   : > { %v3594_v19 = vpop.eup %3593  ;;  %v1905_v20 = vadd.f32 1.0, %v3592_v18 }
 0x32c   : > { %v1911_v21 = vadd.f32 1.0, %v3594_v19  ;;  %v3596_v22 = vpop.eup %3595 }
 0x32d   : > { %3599 = vrcp.f32 %v1905_v20  ;;  %v3598_v24 = vpop.eup %3597  ;;  %v1918_v29 = vadd.f32 1.0, %v3596_v22 }
 0x32e   : > { %3601 = vrcp.f32 %v1911_v21 }
 0x32f   : > { %3603 = vrcp.f32 %v1918_v29 }
 0x337   : > { %v3600_v25 = vpop.eup %3599 }
 0x338   : > { %v3602_v27 = vpop.eup %3601  ;;  %v1922_v28 = vmul.f32 %v3600_v25, %v3598_v24  ;;  %v4862_v24 = vld [vmem:[#allocation11_spill] sm:$0xff]  ;;  %v4863_v25 = vld [vmem:[#allocation12_spill] sm:$0xff] }
 0x339   : > { %v1921_v34 = vmul.f32 %v3602_v27, %v4462_v52  ;;  %v3604_v8 = vpop.eup %3603  ;;  %v4867_v27 = vld [vmem:[#allocation16_spill] sm:$0xff] }
 0x33b   : > { %v1923_v2 = vadd.f32 %v1922_v28, %v1921_v34  ;;  %v2173_v11 = vpop.f32.mrb[20].mxu0  ;;  %v2214_v41 = vpop.f32.mrb[20].mxu1  ;;  %v4868_v28 = vld [vmem:[#allocation17_spill] sm:$0xff] }
 0x33c   : > { %v2221_v45 = vadd.f32 %v2173_v11, %v1942_v32  ;;  %v2175_v42 = vpop.f32.mrb[21].mxu0  ;;  %v2216_v54 = vpop.f32.mrb[21].mxu1  ;;  %v2223_v13 = vadd.f32 %v2214_v41, %v1944_v7  ;;  %v4870_v32 = vld [vmem:[#allocation19_spill] sm:$0xff] }
 0x33d   : > { %3605 = vtanh.f32 %v1923_v2  ;;  %v4720_v57 = vsel %vm1613_vm4, %v1923_v2, %v4462_v52  ;;  %v2222_v59 = vadd.f32 %v2175_v42, %v1943_v36  ;;  %v2177_v60 = vpop.f32.mrb[22].mxu0  ;;  %v2218_v62 = vpop.f32.mrb[22].mxu1  ;;  %v2224_v6 = vadd.f32 %v2216_v54, %v1945_v5 }
 0x33e   : > { %v3244_v63 = vmul.f32 -1.442695, %v2221_v45  ;;  %v2178_v0 = vpop.f32.mrb[23].mxu0  ;;  %v2219_v35 = vpop.f32.mrb[23].mxu1 }
 0x33f   : > { %v3245_v4 = vmul.f32 -1.442695, %v2222_v59  ;;  %v3246_v10 = vmul.f32 -1.442695, %v2224_v6  ;;  %v3249_v59 = vld [vmem:[%s3720_s8 + $0x38] sm:$0xff] }
 0x340   : > { %3607 = vpow2.f32 %v3244_v63  ;;  %v2268_v5 = vunpack.c.h.bf16 %v3249_v59  ;;  %v2267_v7 = vunpack.c.l.bf16 %v3249_v59 }
 0x341   : > { %3609 = vpow2.f32 %v3245_v4 }
 0x342   : > { %3611 = vpow2.f32 %v3246_v10 }
 0x343   : > { %3613 = vtanh.f32 %v2223_v13 }
 0x347   : > { %v3606_v9 = vpop.eup %3605 }
 0x348   : > { %v1925_v12 = vmul.f32 %v3606_v9, %v3604_v8 }
 0x34a   : > { %v3608_v52 = vpop.eup %3607  ;;  %v4725_v14 = vsel %vm1613_vm4, %v1925_v12, %v4467_v46  ;;  %v1930_v15 = vsel %vm1613_vm4, %v1925_v12, 0.0 }
 0x34b   : > { %v3610_v16 = vpop.eup %3609  ;;  %v1931_v17 = vpack.c.bf16 %v1930_v15, %v1930_v15  ;;  %v2228_v18 = vadd.f32 1.0, %v3608_v52  ;;  %v2269_v19 = vpack.c.bf16 %v4725_v14, %v4725_v14 }
 0x34c   : > { %v2234_v20 = vadd.f32 1.0, %v3610_v16  ;;  %v3612_v46 = vpop.eup %3611  ;;  %v2584_v16 = vld [vmem:[%s3725_s12] sm:$0xff] }
 0x34d   : > { %3209 = vst [vmem:[%s3730_s15 + $0x8] sm:$0xf] %v1931_v17  ;;  %3615 = vrcp.f32 %v2228_v18  ;;  %2495 = vmatmul.mubr.bf16.vlgmr.msra.gmra.mrb[24].mxu0 %v2269_v19  ;;  %2536 = vmatmul.mubr.bf16.vlgmr.msra.gmra.mrb[24].mxu1 %v2269_v19 }
 0x34e   : > { %3617 = vrcp.f32 %v2234_v20  ;;  %2784 = vmatpush1.bf16.msra.mxu0 %v4474_v47  ;;  %2825 = vmatpush1.bf16.msra.mxu1 %v4479_v49  ;;  %v3614_v47 = vpop.eup %3613 }
 0x34f   : > { %2785 = vmatprep.subr.bf16.mxu0 %v4486_v37  ;;  %2826 = vmatprep.subr.bf16.mxu1 %v4491_v53  ;;  %v1935_v37 = vstv %s1934_s30  ;;  %v4857_v53 = vld [vmem:[#allocation8_spill] sm:$0xff] }
 0x350   : > { %2815 = vmatprep.mubr.bf16.mxu0 %v4836_v61  ;;  %2856 = vmatprep.mubr.bf16.mxu1 %v4836_v61  ;;  %v4858_v61 = vld [vmem:[#allocation6_spill] sm:$0xff]  ;;  %vm1936_vm5 = vcmp.lt.s32.totalorder %v1935_v37, %v4175_v33 }
 0x352   : > { %2786 = vmatpush1.bf16.msra.mxu0 %v4499_v58  ;;  %2827 = vmatpush1.bf16.msra.mxu1 %v4504_v3  ;;  %v2241_v3 = vadd.f32 1.0, %v3612_v46 }
 0x353   : > { %2787 = vmatprep.subr.bf16.mxu0 %v4511_v38  ;;  %2828 = vmatprep.subr.bf16.mxu1 %v4516_v39 }
 0x354   : > { %3619 = vrcp.f32 %v2241_v3 }
 0x356   : > { %2788 = vmatpush1.bf16.msra.mxu0 %v4525_v56  ;;  %2829 = vmatpush1.bf16.msra.mxu1 %v4530_v1  ;;  %v4859_v56 = vld [vmem:[#allocation7_spill] sm:$0xff]  ;;  %v4860_v1 = vld [vmem:[#allocation9_spill] sm:$0xff] }
 0x357   : > { %v3616_v49 = vpop.eup %3615  ;;  %2789 = vmatprep.subr.bf16.mxu0 %v4857_v53  ;;  %2830 = vmatprep.subr.bf16.mxu1 %v4858_v61  ;;  %v2587_v53 = vunpack.c.h.bf16 %v2584_v16  ;;  %v3655_v61 = vld [vmem:[%s4805_s0] sm:$0xff] }
 0x358   : > { %v3618_v58 = vpop.eup %3617  ;;  %v2245_v21 = vmul.f32 %v3616_v49, %v3614_v47  ;;  %v2586_v49 = vunpack.c.l.bf16 %v2584_v16 }
 0x359   : > { %v2244_v38 = vmul.f32 %v3618_v58, %v4598_v50 }
 0x35a   : > { %2790 = vmatpush1.bf16.msra.mxu0 %v4550_v40  ;;  %2831 = vmatpush1.bf16.msra.mxu1 %v4555_v31  ;;  %v4864_v40 = vld [vmem:[#allocation13_spill] sm:$0xff]  ;;  %v4865_v31 = vld [vmem:[#allocation14_spill] sm:$0xff] }
 0x35b   : > { %v2246_v39 = vadd.f32 %v2245_v21, %v2244_v38  ;;  %2791 = vmatprep.subr.bf16.mxu0 %v4859_v56  ;;  %2832 = vmatprep.subr.bf16.mxu1 %v4860_v1 }
 0x35d   : > { %3621 = vtanh.f32 %v2246_v39  ;;  %v4756_v22 = vsel %vm1936_vm5, %v2246_v39, %v4598_v50  ;;  %v4869_v50 = vld [vmem:[#allocation18_spill] sm:$0xff]  ;;  %v2585_v39 = vld [vmem:[%s3725_s12 + $0x8] sm:$0xff] }
 0x35e   : > { %2792 = vmatpush1.bf16.msra.mxu0 %v4861_v23  ;;  %2833 = vmatpush1.bf16.msra.mxu1 %v4862_v24  ;;  %v3620_v29 = vpop.eup %3619 }
 0x35f   : > { %2793 = vmatprep.subr.bf16.mxu0 %v4863_v25  ;;  %2834 = vmatprep.subr.bf16.mxu1 %v4864_v40 }
 0x362   : > { %2794 = vmatpush1.bf16.msra.mxu0 %v4865_v31  ;;  %2835 = vmatpush1.bf16.msra.mxu1 %v4866_v26 }
 0x363   : > { %2795 = vmatprep.subr.bf16.mxu0 %v4867_v27  ;;  %2836 = vmatprep.subr.bf16.mxu1 %v4868_v28 }
 0x366   : > { %2796 = vmatpush1.bf16.msra.mxu0 %v4869_v50  ;;  %2837 = vmatpush1.bf16.msra.mxu1 %v4870_v32  ;;  %v2588_v32 = vunpack.c.l.bf16 %v2585_v39 }
 0x367   : > { %v3622_v34 = vpop.eup %3621  ;;  %2797 = vmatprep.subr.bf16.mxu0 %v4641_v51  ;;  %2838 = vmatprep.subr.bf16.mxu1 %v4646_v55  ;;  %v3248_v55 = vld [vmem:[%s3720_s8 + $0x30] sm:$0xff]  ;;  %s2257_s8 = sadd.s32 3, %s3709_s23 }
 0x368   : > { %v2248_v36 = vmul.f32 %v3622_v34, %v3620_v29  ;;  %v2265_v45 = vunpack.c.l.bf16 %v3248_v55  ;;  %v2266_v43 = vunpack.c.h.bf16 %v3248_v55  ;;  %v2258_v19 = vstv %s2257_s8 }
 0x369   : > { %vm2259_vm6 = vcmp.lt.s32.totalorder %v2258_v19, %v3655_v61  ;;  %v2589_v29 = vunpack.c.h.bf16 %v2585_v39 }
 0x36a   : > { %v4773_v2 = vsel %vm1936_vm5, %v2248_v36, %v4665_v48  ;;  %v2253_v11 = vsel %vm1936_vm5, %v2248_v36, 0.0  ;;  %2798 = vmatpush1.bf16.msra.mxu0 %v4653_v30  ;;  %2839 = vmatpush1.bf16.msra.mxu1 %v4658_v44 }
 0x36b   : > { %v2254_v41 = vpack.c.bf16 %v2253_v11, %v2253_v11  ;;  %v2590_v51 = vpack.c.bf16 %v4773_v2, %v4773_v2 }
 0x36d   : > { %3247 = vst [vmem:[%s3735_s19 + $0x4] sm:$0xf] %v2254_v41  ;;  %2816 = vmatmul.mubr.bf16.vlgmr.msra.gmra.mrb[28].mxu0 %v2590_v51  ;;  %2857 = vmatmul.mubr.bf16.vlgmr.msra.gmra.mrb[28].mxu1 %v2590_v51 }
 0x420   : > { %v2496_v42 = vpop.f32.mrb[24].mxu0  ;;  %v2537_v48 = vpop.f32.mrb[24].mxu1 }
 0x421   : > { %v2544_v54 = vadd.f32 %v2496_v42, %v2265_v45  ;;  %v2498_v33 = vpop.f32.mrb[25].mxu0  ;;  %v2539_v60 = vpop.f32.mrb[25].mxu1  ;;  %v2546_v9 = vadd.f32 %v2537_v48, %v2267_v7 }
 0x422   : > { %v2545_v62 = vadd.f32 %v2498_v33, %v2266_v43  ;;  %v2500_v30 = vpop.f32.mrb[26].mxu0  ;;  %v2541_v63 = vpop.f32.mrb[26].mxu1  ;;  %v2547_v6 = vadd.f32 %v2539_v60, %v2268_v5 }
 0x423   : > { %v3282_v44 = vmul.f32 -1.442695, %v2544_v54  ;;  %v2501_v0 = vpop.f32.mrb[27].mxu0  ;;  %v2542_v35 = vpop.f32.mrb[27].mxu1 }
 0x424   : > { %v3283_v4 = vmul.f32 -1.442695, %v2545_v62  ;;  %v3284_v8 = vmul.f32 -1.442695, %v2547_v6  ;;  %v2580_v62 = vstv %s3712_s25 }
 0x425   : > { %3623 = vpow2.f32 %v3282_v44  ;;  %vm2581_vm7 = vcmp.lt.s32.totalorder %v2580_v62, %v3655_v61 }
 0x426   : > { %3625 = vpow2.f32 %v3283_v4 }
 0x427   : > { %3627 = vpow2.f32 %v3284_v8 }
 0x428   : > { %3629 = vtanh.f32 %v2546_v9 }
 0x42f   : > { %v3624_v10 = vpop.eup %3623 }
 0x430   : > { %v3626_v12 = vpop.eup %3625  ;;  %v2551_v13 = vadd.f32 1.0, %v3624_v10 }
 0x431   : > { %v2557_v52 = vadd.f32 1.0, %v3626_v12  ;;  %v3628_v15 = vpop.eup %3627 }
 0x432   : > { %3631 = vrcp.f32 %v2551_v13  ;;  %v3630_v17 = vpop.eup %3629  ;;  %v2564_v47 = vadd.f32 1.0, %v3628_v15 }
 0x433   : > { %3633 = vrcp.f32 %v2557_v52 }
 0x434   : > { %3635 = vrcp.f32 %v2564_v47 }
 0x43c   : > { %v3632_v18 = vpop.eup %3631 }
 0x43d   : > { %v3634_v20 = vpop.eup %3633  ;;  %v2568_v46 = vmul.f32 %v3632_v18, %v3630_v17 }
 0x43e   : > { %v2567_v37 = vmul.f32 %v3634_v20, %v4720_v57  ;;  %v3636_v34 = vpop.eup %3635 }
 0x440   : > { %v2569_v58 = vadd.f32 %v2568_v46, %v2567_v37  ;;  %v2817_v21 = vpop.f32.mrb[28].mxu0  ;;  %v2858_v3 = vpop.f32.mrb[28].mxu1 }
 0x441   : > { %v2865_v38 = vadd.f32 %v2817_v21, %v2586_v49  ;;  %v2819_v56 = vpop.f32.mrb[29].mxu0  ;;  %v2860_v1 = vpop.f32.mrb[29].mxu1  ;;  %v2867_v51 = vadd.f32 %v2858_v3, %v2588_v32 }
 0x442   : > { %3637 = vtanh.f32 %v2569_v58  ;;  %v2574_v23 = vsel %vm2259_vm6, %v2569_v58, %v4720_v57  ;;  %v2866_v24 = vadd.f32 %v2819_v56, %v2587_v53  ;;  %v2821_v25 = vpop.f32.mrb[30].mxu0  ;;  %v2862_v40 = vpop.f32.mrb[30].mxu1  ;;  %v2868_v50 = vadd.f32 %v2860_v1, %v2589_v29 }
 0x443   : > { %2575 = vst [vmem:[#allocation3] sm:$0xff] %v2574_v23  ;;  %v3318_v31 = vmul.f32 -1.442695, %v2865_v38  ;;  %v2822_v26 = vpop.f32.mrb[31].mxu0  ;;  %v2863_v27 = vpop.f32.mrb[31].mxu1 }
 0x444   : > { %v3319_v28 = vmul.f32 -1.442695, %v2866_v24  ;;  %v3320_v11 = vmul.f32 -1.442695, %v2868_v50 }
 0x445   : > { %3639 = vpow2.f32 %v3318_v31 }
 0x446   : > { %3641 = vpow2.f32 %v3319_v28 }
 0x447   : > { %3643 = vpow2.f32 %v3320_v11 }
 0x448   : > { %3645 = vtanh.f32 %v2867_v51 }
 0x44c   : > { %v3638_v36 = vpop.eup %3637 }
 0x44d   : > { %v2571_v41 = vmul.f32 %v3638_v36, %v3636_v34 }
 0x44f   : > { %v3640_v57 = vpop.eup %3639  ;;  %v2572_v55 = vsel %vm2259_vm6, %v2571_v41, %v4725_v14  ;;  %v2576_v45 = vsel %vm2259_vm6, %v2571_v41, 0.0 }
 0x450   : > { %v3642_v43 = vpop.eup %3641  ;;  %2573 = vst [vmem:[#allocation2] sm:$0xff] %v2572_v55  ;;  %v2577_v42 = vpack.c.bf16 %v2576_v45, %v2576_v45  ;;  %v2872_v48 = vadd.f32 1.0, %v3640_v57 }
 0x451   : > { %v2878_v54 = vadd.f32 1.0, %v3642_v43  ;;  %v3644_v59 = vpop.eup %3643 }
 0x452   : > { %3285 = vst [vmem:[%s3730_s15 + $0xc] sm:$0xf] %v2577_v42  ;;  %3647 = vrcp.f32 %v2872_v48  ;;  %v3646_v33 = vpop.eup %3645  ;;  %v2885_v14 = vadd.f32 1.0, %v3644_v59 }
 0x453   : > { %3649 = vrcp.f32 %v2878_v54 }
 0x454   : > { %3651 = vrcp.f32 %v2885_v14 }
 0x45c   : > { %v3648_v60 = vpop.eup %3647 }
 0x45d   : > { %v3650_v30 = vpop.eup %3649  ;;  %v2889_v63 = vmul.f32 %v3648_v60, %v3646_v33 }
 0x45e   : > { %v2888_v44 = vmul.f32 %v3650_v30, %v4756_v22  ;;  %v3652_v4 = vpop.eup %3651 }
 0x460   : > { %v2890_v0 = vadd.f32 %v2889_v63, %v2888_v44 }
 0x462   : > { %3653 = vtanh.f32 %v2890_v0  ;;  %v2895_v35 = vsel %vm2581_vm7, %v2890_v0, %v4756_v22 }
 0x463   : > { %2896 = vst [vmem:[#allocation5] sm:$0xff] %v2895_v35 }
 0x46c   : > { %v3654_v5 = vpop.eup %3653 }
 0x46d   : > { %v2892_v6 = vmul.f32 %v3654_v5, %v3652_v4 }
 0x46f   : > { %v2893_v7 = vsel %vm2581_vm7, %v2892_v6, %v4773_v2  ;;  %v2897_v8 = vsel %vm2581_vm7, %v2892_v6, 0.0 }
 0x470   : > { %2894 = vst [vmem:[#allocation4] sm:$0xff] %v2893_v7  ;;  %v2898_v9 = vpack.c.bf16 %v2897_v8, %v2897_v8 }
 0x472   : > { %2899 = vst [vmem:[%s3735_s19] sm:$0xf] %v2898_v9 }
 0x473 PF: > { %s17_s21 = sadd.s32 1, %s3662_s21  }
 0x474   : > { %p14_p6 = scmp.ge.s32.totalorder %s17_s21, 4  }
 0x476   :  { %16 = sbr.rel (!%p14_p6) target bundleno = 1 (0x1), region = 101 }

</bundles_post_ra>
